<compile_context>
chip_gen: v7x
topology: tpu7x:2x2x1
jax: 0.10.0
libtpu: 0.0.40
codegen_flags: <defaults>
</compile_context>

<pallas_src>
import numpy as np
import jax
import jax.numpy as jnp
from jax.experimental import pallas as pl
from jax.experimental.pallas import tpu as pltpu

PER_LAYER = 14  # packed weight/bias tensors per GNN layer
# packed per-layer layout:
#   0: node_w (F,3H) bf16 = [wsa|wda|wpd]    1: node_b (1,3H) f32 = [bsa|bda|bpd]
#   2: wp1 (H,H) bf16     3: bp1 (1,H) f32
#   4: wp2 (H,H) bf16     5: bp2 (1,H) f32
#   6: wp3 (H,F) bf16     7: bp3 (1,F) f32
#   8: wpu (F,H) bf16     9: bpu (1,H) f32
#  10: wt1 (H,TH) bf16   11: bt1 (1,TH) f32
#  12: wt2 (TH,F) bf16   13: bt2 (1,F) f32


# ----------------------------------------------------------------------------- #
# Fused GNNBlock kernel
# ----------------------------------------------------------------------------- #
def make_gnn_block_kernel(n_layers, hidden_dim):
    def kernel(srcc_ref, dstc_ref, dstr_ref, h_ref, e_ref, *rest):
        out_ref = rest[-1]
        wrefs = rest[:-1]
        assert len(wrefs) == n_layers * PER_LAYER
        f32, bf16 = jnp.float32, jnp.bfloat16
        H = hidden_dim

        h = h_ref[...]                         # (N, F) f32 node features
        e = e_ref[...]                         # (E, H) f32 encoded edge features
        N, F = h.shape
        E = e.shape[0]

        # Gather/scatter operators built in-register from the int32 edge lists.
        #   two_hot[k, :]    : 1 at column src[k] and 1 at column N + dst[k]
        #   scatter_dst[v,k] : 1 iff dst[k] == v   (segment-sum as a matmul)
        col_ids2 = jax.lax.broadcasted_iota(jnp.int32, (E, 2 * N), 1)
        two_hot = jnp.logical_or(srcc_ref[...] == col_ids2,
                                 (dstc_ref[...] + N) == col_ids2).astype(bf16)   # (E, 2N)
        row_ids = jax.lax.broadcasted_iota(jnp.int32, (N, E), 0)
        scatter_dst = (dstr_ref[...] == row_ids).astype(bf16)                    # (N, E)

        zeros_nf = jnp.zeros((N, F), f32)      # hoisted (broadcasts are not CSE'd)

        for l in range(n_layers):
            w = wrefs[l * PER_LAYER:(l + 1) * PER_LAYER]   # refs only; load at use
            h_bf = h.astype(bf16)

            # Fused node-granularity affines sharing LHS h:
            #   [hs_aff | hd_aff | a_pd] = h @ [wsa|wda|wpd] + [bsa|bda|bpd]
            node_out = jnp.dot(h_bf, w[0][...], preferred_element_type=f32) + w[1][...]
            hs_aff = node_out[:, :H]
            hd_aff = node_out[:, H:2 * H]
            a_pd = node_out[:, 2 * H:]

            # Fused gather: two_hot @ [[hs_aff, h], [hd_aff, 0]]
            #   [:, :H] = src_code + dst_code (biases already in hs/hd_aff)
            #   [:, H:] = h[src]
            rhs = jnp.concatenate(
                [jnp.concatenate([hs_aff, h], axis=1),
                 jnp.concatenate([hd_aff, zeros_nf], axis=1)], axis=0).astype(bf16)  # (2N, H+F)
            gathered = jnp.dot(two_hot, rhs, preferred_element_type=f32)             # (E, H+F)
            code = gathered[:, :H]
            h_src = gathered[:, H:]

            # phi_function: ReLU, Lin, ReLU, Lin, ReLU, Lin  (hidden -> F)
            t = jnp.maximum(e + code, 0.0)
            t = jnp.maximum(
                jnp.dot(t.astype(bf16), w[2][...], preferred_element_type=f32) + w[3][...], 0.0)
            t = jnp.maximum(
                jnp.dot(t.astype(bf16), w[4][...], preferred_element_type=f32) + w[5][...], 0.0)
            e_emb = jnp.dot(t.astype(bf16), w[6][...], preferred_element_type=f32) + w[7][...]  # (E,F)

            # message passing: m_k = h[src_k] * e_emb_k ; upd[v] = sum_{dst_k=v} m_k
            msg = (h_src * e_emb).astype(bf16)                                        # (E, F)
            upd = jnp.dot(scatter_dst, msg, preferred_element_type=f32)               # (N, F)

            # theta_function(phi_dst_node(h) + phi_updated_node(upd)): ReLU,Lin,ReLU,Lin
            b_pu = jnp.dot(upd.astype(bf16), w[8][...], preferred_element_type=f32) + w[9][...]
            t2 = jnp.maximum(a_pd + b_pu, 0.0)
            t2 = jnp.maximum(
                jnp.dot(t2.astype(bf16), w[10][...], preferred_element_type=f32) + w[11][...], 0.0)
            new = jnp.dot(t2.astype(bf16), w[12][...], preferred_element_type=f32) + w[13][...]

            h = h + new                       # GNNBlock residual: h = h + layer(h)

        out_ref[...] = h.astype(out_ref.dtype)

    return kernel


def pack_layer_params(lp):
    """Fuse shared-LHS weights and pre-cast matmul operands to bf16 (biases stay f32)."""
    (wsa, bsa, wda, bda, wp1, bp1, wp2, bp2, wp3, bp3,
     wpd, bpd, wpu, bpu, wt1, bt1, wt2, bt2) = lp
    bf16 = jnp.bfloat16
    node_w = jnp.concatenate([wsa, wda, wpd], axis=1).astype(bf16)   # (F, 3H)
    node_b = jnp.concatenate([bsa, bda, bpd], axis=1)                # (1, 3H) f32
    return (node_w, node_b,
            wp1.astype(bf16), bp1, wp2.astype(bf16), bp2, wp3.astype(bf16), bp3,
            wpu.astype(bf16), bpu,
            wt1.astype(bf16), bt1, wt2.astype(bf16), bt2)


def gnn_block_forward(h0, e, src, dst, layer_params):
    """Fused GNNBlock forward: one pallas_call covering every layer."""
    N, F = h0.shape
    E, D = e.shape
    H = layer_params[0][0].shape[1]
    assert D == H, "edge_embed_dim must equal hidden_dim (e + src_code + dst_code)"

    srcc = src.reshape(E, 1).astype(jnp.int32)   # (E, 1) for the (E, 2N) two-hot
    dstc = dst.reshape(E, 1).astype(jnp.int32)
    dstr = dst.reshape(1, E).astype(jnp.int32)   # (1, E) for the (N, E) scatter one-hot
    flat_w = [w for lp in layer_params for w in pack_layer_params(lp)]
    args = [srcc, dstc, dstr, h0, e] + flat_w

    vmem = pltpu.MemorySpace.VMEM
    return pl.pallas_call(
        make_gnn_block_kernel(len(layer_params), H),
        out_shape=jax.ShapeDtypeStruct((N, F), jnp.float32),
        in_specs=[pl.BlockSpec(memory_space=vmem) for _ in args],   # whole-array, no pipelining
        out_specs=pl.BlockSpec(memory_space=vmem),
        input_output_aliases={3: 0},                                # h0 buffer -> output buffer
    )(*args)


# ----------------------------------------------------------------------------- #
# Parameter construction (deterministic, synthetic)
# ----------------------------------------------------------------------------- #
def init_linear(key, din, dout):
    kw, kb = jax.random.split(key)
    w = jax.random.normal(kw, (din, dout), jnp.float32) / np.sqrt(din)
    b = 0.1 * jax.random.normal(kb, (1, dout), jnp.float32)
    return w, b


def init_gnn_layer(key, node_feat, hidden, theta_hidden):
    ks = jax.random.split(key, 9)
    wsa, bsa = init_linear(ks[0], node_feat, hidden)        # src_node_affine_function
    wda, bda = init_linear(ks[1], node_feat, hidden)        # dst_node_affine_function
    wp1, bp1 = init_linear(ks[2], hidden, hidden)           # phi_function linear 1
    wp2, bp2 = init_linear(ks[3], hidden, hidden)           # phi_function linear 2
    wp3, bp3 = init_linear(ks[4], hidden, node_feat)        # phi_function linear 3
    wpd, bpd = init_linear(ks[5], node_feat, hidden)        # phi_dst_node
    wpu, bpu = init_linear(ks[6], node_feat, hidden)        # phi_updated_node
    wt1, bt1 = init_linear(ks[7], hidden, theta_hidden)     # theta_function linear 1
    wt2, bt2 = init_linear(ks[8], theta_hidden, node_feat)  # theta_function linear 2
    return (wsa, bsa, wda, bda, wp1, bp1, wp2, bp2, wp3, bp3,
            wpd, bpd, wpu, bpu, wt1, bt1, wt2, bt2)


# ----------------------------------------------------------------------------- #
# Pure-JAX f32 reference (gather / segment_sum formulation)
# ----------------------------------------------------------------------------- #
def gnn_block_reference(h, e, src, dst, layer_params):
    N = h.shape[0]
    for lp in layer_params:
        (wsa, bsa, wda, bda, wp1, bp1, wp2, bp2, wp3, bp3,
         wpd, bpd, wpu, bpu, wt1, bt1, wt2, bt2) = lp
        h_src, h_dst = h[src], h[dst]
        t = e + (h_src @ wsa + bsa) + (h_dst @ wda + bda)
        t = jax.nn.relu(t)
        t = jax.nn.relu(t @ wp1 + bp1)
        t = jax.nn.relu(t @ wp2 + bp2)
        e_emb = t @ wp3 + bp3
        upd = jax.ops.segment_sum(h_src * e_emb, dst, num_segments=N)
        t2 = jax.nn.relu((h @ wpd + bpd) + (upd @ wpu + bpu))
        t2 = jax.nn.relu(t2 @ wt1 + bt1)
        h = h + (t2 @ wt2 + bt2)
    return h


# ----------------------------------------------------------------------------- #
if __name__ == "__main__":
    # small config: in_node_feat = out_node_feat = 128 (needed for the residual),
    # hidden_dim = edge_embed_dim = 128, 2 GNN layers, theta MLP hidden = 128
    # (the torch MLP default). All feature dims lane-dense (128).
    N = 16
    F = 128
    H = 128
    THETA_H = 128
    N_LAYERS = 2

    # deterministic ring graph: node i receives messages from 4 neighbours -> E = 64
    idx = np.arange(N)
    offs = np.array([1, 2, N - 1, N - 2])
    src_np = ((idx[:, None] + offs[None, :]) % N).reshape(-1).astype(np.int32)
    dst_np = np.repeat(idx, len(offs)).astype(np.int32)
    E = int(src_np.shape[0])

    key = jax.random.PRNGKey(0)
    k_h, k_e, k_layers = jax.random.split(key, 3)
    h0 = jax.random.normal(k_h, (N, F), jnp.float32)
    e = jax.random.normal(k_e, (E, H), jnp.float32)
    layer_params = [init_gnn_layer(k, F, H, THETA_H)
                    for k in jax.random.split(k_layers, N_LAYERS)]

    src = jnp.asarray(src_np)
    dst = jnp.asarray(dst_np)

    ref = jax.block_until_ready(gnn_block_reference(h0, e, src, dst, layer_params))
    out = jax.block_until_ready(gnn_block_forward(h0, e, src, dst, layer_params))

    out_np, ref_np = np.asarray(out), np.asarray(ref)
    # bf16 matmul operands (f32 accumulation) vs. the pure-f32 reference:
    # allow a few percent relative error; real functional bugs are O(1) off.
    if not np.allclose(out_np, ref_np, rtol=5e-2, atol=1e-1):
        err = float(np.max(np.abs(out_np - ref_np)))
        rel = err / (float(np.max(np.abs(ref_np))) + 1e-9)
        raise AssertionError(
            f"Pallas GNNBlock output mismatch (max abs err {err:.3e}, rel {rel:.3e})")

    print("KERNEL_OK")
</pallas_src>

<mosaic_0001>
module attributes {stable_mosaic.version = 11 : i64} {
  func.func @kernel(%arg0: memref<64x1xi32, #tpu.memory_space<vmem>>, %arg1: memref<64x1xi32, #tpu.memory_space<vmem>>, %arg2: memref<1x64xi32, #tpu.memory_space<vmem>>, %arg3: memref<16x128xf32, #tpu.memory_space<vmem>>, %arg4: memref<64x128xf32, #tpu.memory_space<vmem>>, %arg5: memref<128x384xbf16, #tpu.memory_space<vmem>>, %arg6: memref<1x384xf32, #tpu.memory_space<vmem>>, %arg7: memref<128x128xbf16, #tpu.memory_space<vmem>>, %arg8: memref<1x128xf32, #tpu.memory_space<vmem>>, %arg9: memref<128x128xbf16, #tpu.memory_space<vmem>>, %arg10: memref<1x128xf32, #tpu.memory_space<vmem>>, %arg11: memref<128x128xbf16, #tpu.memory_space<vmem>>, %arg12: memref<1x128xf32, #tpu.memory_space<vmem>>, %arg13: memref<128x128xbf16, #tpu.memory_space<vmem>>, %arg14: memref<1x128xf32, #tpu.memory_space<vmem>>, %arg15: memref<128x128xbf16, #tpu.memory_space<vmem>>, %arg16: memref<1x128xf32, #tpu.memory_space<vmem>>, %arg17: memref<128x128xbf16, #tpu.memory_space<vmem>>, %arg18: memref<1x128xf32, #tpu.memory_space<vmem>>, %arg19: memref<128x384xbf16, #tpu.memory_space<vmem>>, %arg20: memref<1x384xf32, #tpu.memory_space<vmem>>, %arg21: memref<128x128xbf16, #tpu.memory_space<vmem>>, %arg22: memref<1x128xf32, #tpu.memory_space<vmem>>, %arg23: memref<128x128xbf16, #tpu.memory_space<vmem>>, %arg24: memref<1x128xf32, #tpu.memory_space<vmem>>, %arg25: memref<128x128xbf16, #tpu.memory_space<vmem>>, %arg26: memref<1x128xf32, #tpu.memory_space<vmem>>, %arg27: memref<128x128xbf16, #tpu.memory_space<vmem>>, %arg28: memref<1x128xf32, #tpu.memory_space<vmem>>, %arg29: memref<128x128xbf16, #tpu.memory_space<vmem>>, %arg30: memref<1x128xf32, #tpu.memory_space<vmem>>, %arg31: memref<128x128xbf16, #tpu.memory_space<vmem>>, %arg32: memref<1x128xf32, #tpu.memory_space<vmem>>, %arg33: memref<16x128xf32, #tpu.memory_space<vmem>>) attributes {dimension_semantics = [], scalar_prefetch = 0 : i64, scratch_operands = 0 : i64, tpu.core_type = #tpu.core_type<tc>} {
    %c0 = arith.constant 0 : index
    %c0_0 = arith.constant 0 : index
    %0 = vector.load %arg3[%c0, %c0_0] : memref<16x128xf32, #tpu.memory_space<vmem>>, vector<16x128xf32>
    %c0_1 = arith.constant 0 : index
    %c0_2 = arith.constant 0 : index
    %1 = vector.load %arg4[%c0_1, %c0_2] : memref<64x128xf32, #tpu.memory_space<vmem>>, vector<64x128xf32>
    %2 = tpu.iota {dimensions = array<i32: 1>} : vector<64x32xi32>
    %c0_3 = arith.constant 0 : index
    %c0_4 = arith.constant 0 : index
    %3 = vector.load %arg0[%c0_3, %c0_4] : memref<64x1xi32, #tpu.memory_space<vmem>>, vector<64x1xi32>
    %4 = vector.broadcast %3 : vector<64x1xi32> to vector<64x32xi32>
    %5 = arith.cmpi eq, %4, %2 : vector<64x32xi32>
    %c0_5 = arith.constant 0 : index
    %c0_6 = arith.constant 0 : index
    %6 = vector.load %arg1[%c0_5, %c0_6] : memref<64x1xi32, #tpu.memory_space<vmem>>, vector<64x1xi32>
    %c16_i32 = arith.constant 16 : i32
    %7 = vector.broadcast %c16_i32 : i32 to vector<64x1xi32>
    %8 = arith.addi %6, %7 : vector<64x1xi32>
    %9 = vector.broadcast %8 : vector<64x1xi32> to vector<64x32xi32>
    %10 = arith.cmpi eq, %9, %2 : vector<64x32xi32>
    %11 = arith.ori %5, %10 : vector<64x32xi1>
    %12 = arith.extui %11 : vector<64x32xi1> to vector<64x32xi32>
    %13 = arith.sitofp %12 : vector<64x32xi32> to vector<64x32xf32>
    %14 = arith.truncf %13 : vector<64x32xf32> to vector<64x32xbf16>
    %15 = tpu.iota {dimensions = array<i32: 0>} : vector<16x64xi32>
    %c0_7 = arith.constant 0 : index
    %c0_8 = arith.constant 0 : index
    %16 = vector.load %arg2[%c0_7, %c0_8] : memref<1x64xi32, #tpu.memory_space<vmem>>, vector<1x64xi32>
    %17 = vector.broadcast %16 : vector<1x64xi32> to vector<16x64xi32>
    %18 = arith.cmpi eq, %17, %15 : vector<16x64xi32>
    %19 = arith.extui %18 : vector<16x64xi1> to vector<16x64xi32>
    %20 = arith.sitofp %19 : vector<16x64xi32> to vector<16x64xf32>
    %21 = arith.truncf %20 : vector<16x64xf32> to vector<16x64xbf16>
    %cst = arith.constant 0.000000e+00 : f32
    %22 = vector.broadcast %cst : f32 to vector<16x128xf32>
    %23 = arith.truncf %0 : vector<16x128xf32> to vector<16x128xbf16>
    %c0_9 = arith.constant 0 : index
    %c0_10 = arith.constant 0 : index
    %24 = vector.load %arg5[%c0_9, %c0_10] : memref<128x384xbf16, #tpu.memory_space<vmem>>, vector<128x384xbf16>
    %cst_11 = arith.constant dense<0.000000e+00> : vector<16x384xf32>
    %25 = tpu.matmul %23, %24, %cst_11 {dimension_numbers = #tpu.dot_dimension_numbers<[1], [0], [0], [1], [0, 0, 1, 1], [], []>} : vector<16x128xbf16>, vector<128x384xbf16>, vector<16x384xf32> -> vector<16x384xf32>
    %c0_12 = arith.constant 0 : index
    %c0_13 = arith.constant 0 : index
    %26 = vector.load %arg6[%c0_12, %c0_13] : memref<1x384xf32, #tpu.memory_space<vmem>>, vector<1x384xf32>
    %27 = vector.broadcast %26 : vector<1x384xf32> to vector<16x384xf32>
    %28 = arith.addf %25, %27 : vector<16x384xf32>
    %29 = vector.extract_strided_slice %28 {offsets = [0, 0], sizes = [16, 128], strides = [1, 1]} : vector<16x384xf32> to vector<16x128xf32>
    %30 = vector.extract_strided_slice %28 {offsets = [0, 128], sizes = [16, 128], strides = [1, 1]} : vector<16x384xf32> to vector<16x128xf32>
    %31 = vector.extract_strided_slice %28 {offsets = [0, 256], sizes = [16, 128], strides = [1, 1]} : vector<16x384xf32> to vector<16x128xf32>
    %32 = tpu.concatenate %29, %0 in 1 : vector<16x128xf32>, vector<16x128xf32> -> vector<16x256xf32>
    %33 = tpu.concatenate %30, %22 in 1 : vector<16x128xf32>, vector<16x128xf32> -> vector<16x256xf32>
    %34 = tpu.concatenate %32, %33 in 0 : vector<16x256xf32>, vector<16x256xf32> -> vector<32x256xf32>
    %35 = arith.truncf %34 : vector<32x256xf32> to vector<32x256xbf16>
    %cst_14 = arith.constant dense<0.000000e+00> : vector<64x256xf32>
    %36 = tpu.matmul %14, %35, %cst_14 {dimension_numbers = #tpu.dot_dimension_numbers<[1], [0], [0], [1], [0, 0, 1, 1], [], []>} : vector<64x32xbf16>, vector<32x256xbf16>, vector<64x256xf32> -> vector<64x256xf32>
    %37 = vector.extract_strided_slice %36 {offsets = [0, 0], sizes = [64, 128], strides = [1, 1]} : vector<64x256xf32> to vector<64x128xf32>
    %38 = vector.extract_strided_slice %36 {offsets = [0, 128], sizes = [64, 128], strides = [1, 1]} : vector<64x256xf32> to vector<64x128xf32>
    %39 = arith.addf %1, %37 : vector<64x128xf32>
    %cst_15 = arith.constant 0.000000e+00 : f32
    %40 = vector.broadcast %cst_15 : f32 to vector<64x128xf32>
    %41 = arith.maximumf %39, %40 : vector<64x128xf32>
    %42 = arith.truncf %41 : vector<64x128xf32> to vector<64x128xbf16>
    %c0_16 = arith.constant 0 : index
    %c0_17 = arith.constant 0 : index
    %43 = vector.load %arg7[%c0_16, %c0_17] : memref<128x128xbf16, #tpu.memory_space<vmem>>, vector<128x128xbf16>
    %cst_18 = arith.constant dense<0.000000e+00> : vector<64x128xf32>
    %44 = tpu.matmul %42, %43, %cst_18 {dimension_numbers = #tpu.dot_dimension_numbers<[1], [0], [0], [1], [0, 0, 1, 1], [], []>} : vector<64x128xbf16>, vector<128x128xbf16>, vector<64x128xf32> -> vector<64x128xf32>
    %c0_19 = arith.constant 0 : index
    %c0_20 = arith.constant 0 : index
    %45 = vector.load %arg8[%c0_19, %c0_20] : memref<1x128xf32, #tpu.memory_space<vmem>>, vector<1x128xf32>
    %46 = vector.broadcast %45 : vector<1x128xf32> to vector<64x128xf32>
    %47 = arith.addf %44, %46 : vector<64x128xf32>
    %cst_21 = arith.constant 0.000000e+00 : f32
    %48 = vector.broadcast %cst_21 : f32 to vector<64x128xf32>
    %49 = arith.maximumf %47, %48 : vector<64x128xf32>
    %50 = arith.truncf %49 : vector<64x128xf32> to vector<64x128xbf16>
    %c0_22 = arith.constant 0 : index
    %c0_23 = arith.constant 0 : index
    %51 = vector.load %arg9[%c0_22, %c0_23] : memref<128x128xbf16, #tpu.memory_space<vmem>>, vector<128x128xbf16>
    %cst_24 = arith.constant dense<0.000000e+00> : vector<64x128xf32>
    %52 = tpu.matmul %50, %51, %cst_24 {dimension_numbers = #tpu.dot_dimension_numbers<[1], [0], [0], [1], [0, 0, 1, 1], [], []>} : vector<64x128xbf16>, vector<128x128xbf16>, vector<64x128xf32> -> vector<64x128xf32>
    %c0_25 = arith.constant 0 : index
    %c0_26 = arith.constant 0 : index
    %53 = vector.load %arg10[%c0_25, %c0_26] : memref<1x128xf32, #tpu.memory_space<vmem>>, vector<1x128xf32>
    %54 = vector.broadcast %53 : vector<1x128xf32> to vector<64x128xf32>
    %55 = arith.addf %52, %54 : vector<64x128xf32>
    %cst_27 = arith.constant 0.000000e+00 : f32
    %56 = vector.broadcast %cst_27 : f32 to vector<64x128xf32>
    %57 = arith.maximumf %55, %56 : vector<64x128xf32>
    %58 = arith.truncf %57 : vector<64x128xf32> to vector<64x128xbf16>
    %c0_28 = arith.constant 0 : index
    %c0_29 = arith.constant 0 : index
    %59 = vector.load %arg11[%c0_28, %c0_29] : memref<128x128xbf16, #tpu.memory_space<vmem>>, vector<128x128xbf16>
    %cst_30 = arith.constant dense<0.000000e+00> : vector<64x128xf32>
    %60 = tpu.matmul %58, %59, %cst_30 {dimension_numbers = #tpu.dot_dimension_numbers<[1], [0], [0], [1], [0, 0, 1, 1], [], []>} : vector<64x128xbf16>, vector<128x128xbf16>, vector<64x128xf32> -> vector<64x128xf32>
    %c0_31 = arith.constant 0 : index
    %c0_32 = arith.constant 0 : index
    %61 = vector.load %arg12[%c0_31, %c0_32] : memref<1x128xf32, #tpu.memory_space<vmem>>, vector<1x128xf32>
    %62 = vector.broadcast %61 : vector<1x128xf32> to vector<64x128xf32>
    %63 = arith.addf %60, %62 : vector<64x128xf32>
    %64 = arith.mulf %38, %63 : vector<64x128xf32>
    %65 = arith.truncf %64 : vector<64x128xf32> to vector<64x128xbf16>
    %cst_33 = arith.constant dense<0.000000e+00> : vector<16x128xf32>
    %66 = tpu.matmul %21, %65, %cst_33 {dimension_numbers = #tpu.dot_dimension_numbers<[1], [0], [0], [1], [0, 0, 1, 1], [], []>} : vector<16x64xbf16>, vector<64x128xbf16>, vector<16x128xf32> -> vector<16x128xf32>
    %67 = arith.truncf %66 : vector<16x128xf32> to vector<16x128xbf16>
    %c0_34 = arith.constant 0 : index
    %c0_35 = arith.constant 0 : index
    %68 = vector.load %arg13[%c0_34, %c0_35] : memref<128x128xbf16, #tpu.memory_space<vmem>>, vector<128x128xbf16>
    %cst_36 = arith.constant dense<0.000000e+00> : vector<16x128xf32>
    %69 = tpu.matmul %67, %68, %cst_36 {dimension_numbers = #tpu.dot_dimension_numbers<[1], [0], [0], [1], [0, 0, 1, 1], [], []>} : vector<16x128xbf16>, vector<128x128xbf16>, vector<16x128xf32> -> vector<16x128xf32>
    %c0_37 = arith.constant 0 : index
    %c0_38 = arith.constant 0 : index
    %70 = vector.load %arg14[%c0_37, %c0_38] : memref<1x128xf32, #tpu.memory_space<vmem>>, vector<1x128xf32>
    %71 = vector.broadcast %70 : vector<1x128xf32> to vector<16x128xf32>
    %72 = arith.addf %69, %71 : vector<16x128xf32>
    %73 = arith.addf %31, %72 : vector<16x128xf32>
    %cst_39 = arith.constant 0.000000e+00 : f32
    %74 = vector.broadcast %cst_39 : f32 to vector<16x128xf32>
    %75 = arith.maximumf %73, %74 : vector<16x128xf32>
    %76 = arith.truncf %75 : vector<16x128xf32> to vector<16x128xbf16>
    %c0_40 = arith.constant 0 : index
    %c0_41 = arith.constant 0 : index
    %77 = vector.load %arg15[%c0_40, %c0_41] : memref<128x128xbf16, #tpu.memory_space<vmem>>, vector<128x128xbf16>
    %cst_42 = arith.constant dense<0.000000e+00> : vector<16x128xf32>
    %78 = tpu.matmul %76, %77, %cst_42 {dimension_numbers = #tpu.dot_dimension_numbers<[1], [0], [0], [1], [0, 0, 1, 1], [], []>} : vector<16x128xbf16>, vector<128x128xbf16>, vector<16x128xf32> -> vector<16x128xf32>
    %c0_43 = arith.constant 0 : index
    %c0_44 = arith.constant 0 : index
    %79 = vector.load %arg16[%c0_43, %c0_44] : memref<1x128xf32, #tpu.memory_space<vmem>>, vector<1x128xf32>
    %80 = vector.broadcast %79 : vector<1x128xf32> to vector<16x128xf32>
    %81 = arith.addf %78, %80 : vector<16x128xf32>
    %cst_45 = arith.constant 0.000000e+00 : f32
    %82 = vector.broadcast %cst_45 : f32 to vector<16x128xf32>
    %83 = arith.maximumf %81, %82 : vector<16x128xf32>
    %84 = arith.truncf %83 : vector<16x128xf32> to vector<16x128xbf16>
    %c0_46 = arith.constant 0 : index
    %c0_47 = arith.constant 0 : index
    %85 = vector.load %arg17[%c0_46, %c0_47] : memref<128x128xbf16, #tpu.memory_space<vmem>>, vector<128x128xbf16>
    %cst_48 = arith.constant dense<0.000000e+00> : vector<16x128xf32>
    %86 = tpu.matmul %84, %85, %cst_48 {dimension_numbers = #tpu.dot_dimension_numbers<[1], [0], [0], [1], [0, 0, 1, 1], [], []>} : vector<16x128xbf16>, vector<128x128xbf16>, vector<16x128xf32> -> vector<16x128xf32>
    %c0_49 = arith.constant 0 : index
    %c0_50 = arith.constant 0 : index
    %87 = vector.load %arg18[%c0_49, %c0_50] : memref<1x128xf32, #tpu.memory_space<vmem>>, vector<1x128xf32>
    %88 = vector.broadcast %87 : vector<1x128xf32> to vector<16x128xf32>
    %89 = arith.addf %86, %88 : vector<16x128xf32>
    %90 = arith.addf %0, %89 : vector<16x128xf32>
    %91 = arith.truncf %90 : vector<16x128xf32> to vector<16x128xbf16>
    %c0_51 = arith.constant 0 : index
    %c0_52 = arith.constant 0 : index
    %92 = vector.load %arg19[%c0_51, %c0_52] : memref<128x384xbf16, #tpu.memory_space<vmem>>, vector<128x384xbf16>
    %cst_53 = arith.constant dense<0.000000e+00> : vector<16x384xf32>
    %93 = tpu.matmul %91, %92, %cst_53 {dimension_numbers = #tpu.dot_dimension_numbers<[1], [0], [0], [1], [0, 0, 1, 1], [], []>} : vector<16x128xbf16>, vector<128x384xbf16>, vector<16x384xf32> -> vector<16x384xf32>
    %c0_54 = arith.constant 0 : index
    %c0_55 = arith.constant 0 : index
    %94 = vector.load %arg20[%c0_54, %c0_55] : memref<1x384xf32, #tpu.memory_space<vmem>>, vector<1x384xf32>
    %95 = vector.broadcast %94 : vector<1x384xf32> to vector<16x384xf32>
    %96 = arith.addf %93, %95 : vector<16x384xf32>
    %97 = vector.extract_strided_slice %96 {offsets = [0, 0], sizes = [16, 128], strides = [1, 1]} : vector<16x384xf32> to vector<16x128xf32>
    %98 = vector.extract_strided_slice %96 {offsets = [0, 128], sizes = [16, 128], strides = [1, 1]} : vector<16x384xf32> to vector<16x128xf32>
    %99 = vector.extract_strided_slice %96 {offsets = [0, 256], sizes = [16, 128], strides = [1, 1]} : vector<16x384xf32> to vector<16x128xf32>
    %100 = tpu.concatenate %97, %90 in 1 : vector<16x128xf32>, vector<16x128xf32> -> vector<16x256xf32>
    %101 = tpu.concatenate %98, %22 in 1 : vector<16x128xf32>, vector<16x128xf32> -> vector<16x256xf32>
    %102 = tpu.concatenate %100, %101 in 0 : vector<16x256xf32>, vector<16x256xf32> -> vector<32x256xf32>
    %103 = arith.truncf %102 : vector<32x256xf32> to vector<32x256xbf16>
    %cst_56 = arith.constant dense<0.000000e+00> : vector<64x256xf32>
    %104 = tpu.matmul %14, %103, %cst_56 {dimension_numbers = #tpu.dot_dimension_numbers<[1], [0], [0], [1], [0, 0, 1, 1], [], []>} : vector<64x32xbf16>, vector<32x256xbf16>, vector<64x256xf32> -> vector<64x256xf32>
    %105 = vector.extract_strided_slice %104 {offsets = [0, 0], sizes = [64, 128], strides = [1, 1]} : vector<64x256xf32> to vector<64x128xf32>
    %106 = vector.extract_strided_slice %104 {offsets = [0, 128], sizes = [64, 128], strides = [1, 1]} : vector<64x256xf32> to vector<64x128xf32>
    %107 = arith.addf %1, %105 : vector<64x128xf32>
    %cst_57 = arith.constant 0.000000e+00 : f32
    %108 = vector.broadcast %cst_57 : f32 to vector<64x128xf32>
    %109 = arith.maximumf %107, %108 : vector<64x128xf32>
    %110 = arith.truncf %109 : vector<64x128xf32> to vector<64x128xbf16>
    %c0_58 = arith.constant 0 : index
    %c0_59 = arith.constant 0 : index
    %111 = vector.load %arg21[%c0_58, %c0_59] : memref<128x128xbf16, #tpu.memory_space<vmem>>, vector<128x128xbf16>
    %cst_60 = arith.constant dense<0.000000e+00> : vector<64x128xf32>
    %112 = tpu.matmul %110, %111, %cst_60 {dimension_numbers = #tpu.dot_dimension_numbers<[1], [0], [0], [1], [0, 0, 1, 1], [], []>} : vector<64x128xbf16>, vector<128x128xbf16>, vector<64x128xf32> -> vector<64x128xf32>
    %c0_61 = arith.constant 0 : index
    %c0_62 = arith.constant 0 : index
    %113 = vector.load %arg22[%c0_61, %c0_62] : memref<1x128xf32, #tpu.memory_space<vmem>>, vector<1x128xf32>
    %114 = vector.broadcast %113 : vector<1x128xf32> to vector<64x128xf32>
    %115 = arith.addf %112, %114 : vector<64x128xf32>
    %cst_63 = arith.constant 0.000000e+00 : f32
    %116 = vector.broadcast %cst_63 : f32 to vector<64x128xf32>
    %117 = arith.maximumf %115, %116 : vector<64x128xf32>
    %118 = arith.truncf %117 : vector<64x128xf32> to vector<64x128xbf16>
    %c0_64 = arith.constant 0 : index
    %c0_65 = arith.constant 0 : index
    %119 = vector.load %arg23[%c0_64, %c0_65] : memref<128x128xbf16, #tpu.memory_space<vmem>>, vector<128x128xbf16>
    %cst_66 = arith.constant dense<0.000000e+00> : vector<64x128xf32>
    %120 = tpu.matmul %118, %119, %cst_66 {dimension_numbers = #tpu.dot_dimension_numbers<[1], [0], [0], [1], [0, 0, 1, 1], [], []>} : vector<64x128xbf16>, vector<128x128xbf16>, vector<64x128xf32> -> vector<64x128xf32>
    %c0_67 = arith.constant 0 : index
    %c0_68 = arith.constant 0 : index
    %121 = vector.load %arg24[%c0_67, %c0_68] : memref<1x128xf32, #tpu.memory_space<vmem>>, vector<1x128xf32>
    %122 = vector.broadcast %121 : vector<1x128xf32> to vector<64x128xf32>
    %123 = arith.addf %120, %122 : vector<64x128xf32>
    %cst_69 = arith.constant 0.000000e+00 : f32
    %124 = vector.broadcast %cst_69 : f32 to vector<64x128xf32>
    %125 = arith.maximumf %123, %124 : vector<64x128xf32>
    %126 = arith.truncf %125 : vector<64x128xf32> to vector<64x128xbf16>
    %c0_70 = arith.constant 0 : index
    %c0_71 = arith.constant 0 : index
    %127 = vector.load %arg25[%c0_70, %c0_71] : memref<128x128xbf16, #tpu.memory_space<vmem>>, vector<128x128xbf16>
    %cst_72 = arith.constant dense<0.000000e+00> : vector<64x128xf32>
    %128 = tpu.matmul %126, %127, %cst_72 {dimension_numbers = #tpu.dot_dimension_numbers<[1], [0], [0], [1], [0, 0, 1, 1], [], []>} : vector<64x128xbf16>, vector<128x128xbf16>, vector<64x128xf32> -> vector<64x128xf32>
    %c0_73 = arith.constant 0 : index
    %c0_74 = arith.constant 0 : index
    %129 = vector.load %arg26[%c0_73, %c0_74] : memref<1x128xf32, #tpu.memory_space<vmem>>, vector<1x128xf32>
    %130 = vector.broadcast %129 : vector<1x128xf32> to vector<64x128xf32>
    %131 = arith.addf %128, %130 : vector<64x128xf32>
    %132 = arith.mulf %106, %131 : vector<64x128xf32>
    %133 = arith.truncf %132 : vector<64x128xf32> to vector<64x128xbf16>
    %cst_75 = arith.constant dense<0.000000e+00> : vector<16x128xf32>
    %134 = tpu.matmul %21, %133, %cst_75 {dimension_numbers = #tpu.dot_dimension_numbers<[1], [0], [0], [1], [0, 0, 1, 1], [], []>} : vector<16x64xbf16>, vector<64x128xbf16>, vector<16x128xf32> -> vector<16x128xf32>
    %135 = arith.truncf %134 : vector<16x128xf32> to vector<16x128xbf16>
    %c0_76 = arith.constant 0 : index
    %c0_77 = arith.constant 0 : index
    %136 = vector.load %arg27[%c0_76, %c0_77] : memref<128x128xbf16, #tpu.memory_space<vmem>>, vector<128x128xbf16>
    %cst_78 = arith.constant dense<0.000000e+00> : vector<16x128xf32>
    %137 = tpu.matmul %135, %136, %cst_78 {dimension_numbers = #tpu.dot_dimension_numbers<[1], [0], [0], [1], [0, 0, 1, 1], [], []>} : vector<16x128xbf16>, vector<128x128xbf16>, vector<16x128xf32> -> vector<16x128xf32>
    %c0_79 = arith.constant 0 : index
    %c0_80 = arith.constant 0 : index
    %138 = vector.load %arg28[%c0_79, %c0_80] : memref<1x128xf32, #tpu.memory_space<vmem>>, vector<1x128xf32>
    %139 = vector.broadcast %138 : vector<1x128xf32> to vector<16x128xf32>
    %140 = arith.addf %137, %139 : vector<16x128xf32>
    %141 = arith.addf %99, %140 : vector<16x128xf32>
    %cst_81 = arith.constant 0.000000e+00 : f32
    %142 = vector.broadcast %cst_81 : f32 to vector<16x128xf32>
    %143 = arith.maximumf %141, %142 : vector<16x128xf32>
    %144 = arith.truncf %143 : vector<16x128xf32> to vector<16x128xbf16>
    %c0_82 = arith.constant 0 : index
    %c0_83 = arith.constant 0 : index
    %145 = vector.load %arg29[%c0_82, %c0_83] : memref<128x128xbf16, #tpu.memory_space<vmem>>, vector<128x128xbf16>
    %cst_84 = arith.constant dense<0.000000e+00> : vector<16x128xf32>
    %146 = tpu.matmul %144, %145, %cst_84 {dimension_numbers = #tpu.dot_dimension_numbers<[1], [0], [0], [1], [0, 0, 1, 1], [], []>} : vector<16x128xbf16>, vector<128x128xbf16>, vector<16x128xf32> -> vector<16x128xf32>
    %c0_85 = arith.constant 0 : index
    %c0_86 = arith.constant 0 : index
    %147 = vector.load %arg30[%c0_85, %c0_86] : memref<1x128xf32, #tpu.memory_space<vmem>>, vector<1x128xf32>
    %148 = vector.broadcast %147 : vector<1x128xf32> to vector<16x128xf32>
    %149 = arith.addf %146, %148 : vector<16x128xf32>
    %cst_87 = arith.constant 0.000000e+00 : f32
    %150 = vector.broadcast %cst_87 : f32 to vector<16x128xf32>
    %151 = arith.maximumf %149, %150 : vector<16x128xf32>
    %152 = arith.truncf %151 : vector<16x128xf32> to vector<16x128xbf16>
    %c0_88 = arith.constant 0 : index
    %c0_89 = arith.constant 0 : index
    %153 = vector.load %arg31[%c0_88, %c0_89] : memref<128x128xbf16, #tpu.memory_space<vmem>>, vector<128x128xbf16>
    %cst_90 = arith.constant dense<0.000000e+00> : vector<16x128xf32>
    %154 = tpu.matmul %152, %153, %cst_90 {dimension_numbers = #tpu.dot_dimension_numbers<[1], [0], [0], [1], [0, 0, 1, 1], [], []>} : vector<16x128xbf16>, vector<128x128xbf16>, vector<16x128xf32> -> vector<16x128xf32>
    %c0_91 = arith.constant 0 : index
    %c0_92 = arith.constant 0 : index
    %155 = vector.load %arg32[%c0_91, %c0_92] : memref<1x128xf32, #tpu.memory_space<vmem>>, vector<1x128xf32>
    %156 = vector.broadcast %155 : vector<1x128xf32> to vector<16x128xf32>
    %157 = arith.addf %154, %156 : vector<16x128xf32>
    %158 = arith.addf %90, %157 : vector<16x128xf32>
    %c0_93 = arith.constant 0 : index
    %c0_94 = arith.constant 0 : index
    %159 = vector.load %arg33[%c0_93, %c0_94] : memref<16x128xf32, #tpu.memory_space<vmem>>, vector<16x128xf32>
    tpu.vector_store %arg33[%c0_93, %c0_94], %158 {strides = array<i32>} : memref<16x128xf32, #tpu.memory_space<vmem>>, vector<16x128xf32>,
    return
  }
}

</mosaic_0001>

<bundles_post_ra>
// kernel: tpu_custom_call.1
= control target key start
LH: loop header
LB: loop body
LE: loop exit
PB: predicated region body
PF: predicated region fallthrough
CT: control target
= control target key end

     0   :  { %s4605_s6 = smov 1   ;;  %s4606_s10 = smov 2   ;;  %s5332_s0 = inlined_call_operand.smem [shape: u32[34], index: -1, kind: input, shape index: {}] }
   0x1   :  { %s4683_s5 = sld [smem:[%s5332_s0]]   ;;  %s4607_s14 = smov 3  }
   0x2   :  { %s4688_s9 = sld [smem:[%s5332_s0 + %s4605_s6]]   ;;  %s4608_s18 = smov 4  }
   0x3   :  { %s4693_s13 = sld [smem:[%s5332_s0 + %s4606_s10]]   ;;  %s4609_s22 = smov 5  }
   0x4   :  { %s4698_s17 = sld [smem:[%s5332_s0 + %s4607_s14]]   ;;  %s4610_s26 = smov 6  }
   0x5   :  { %s4703_s21 = sld [smem:[%s5332_s0 + %s4608_s18]]   ;;  %s4611_s30 = smov 7  }
   0x6   :  { %s4708_s25 = sld [smem:[%s5332_s0 + %s4609_s22]]   ;;  %s4612_s4 = smov 8  }
   0x7   :  { %5346 = sst [smem:[#allocation59_spill]] %s4683_s5  ;;  %s4613_s10 = smov 9  }
   0x8   :  { %5347 = sst [smem:[#allocation60_spill]] %s4688_s9  ;;  %s4614_s15 = smov 10  }
   0x9   :  { %5348 = sst [smem:[#allocation61_spill]] %s4693_s13  ;;  %s4615_s20 = smov 11  }
   0xa   :  { %s4713_s29 = sld [smem:[%s5332_s0 + %s4610_s26]]   ;;  %s4616_s26 = smov 12  }
   0xb   :  { %5349 = sst [smem:[#allocation62_spill]] %s4703_s21  ;;  %s4617_s1 = smov 13  }
   0xc   :  { %5350 = sst [smem:[#allocation63_spill]] %s4708_s25  ;;  %s4618_s7 = smov 14  }
   0xd   :  { %s4718_s3 = sld [smem:[%s5332_s0 + %s4611_s30]]   ;;  %s4620_s22 = smov 16  }
   0xe   :  { %s4723_s8 = sld [smem:[%s5332_s0 + %s4612_s4]]   ;;  %s4621_s28 = smov 17  }
   0xf   :  { %s4728_s14 = sld [smem:[%s5332_s0 + %s4613_s10]]  }
  0x10   :  { %5351 = sst [smem:[#allocation64_spill]] %s4713_s29 }
  0x11   :  { %s4733_s19 = sld [smem:[%s5332_s0 + %s4614_s15]]   ;;  %s4619_s15 = smov 15  }
  0x12   :  { %s4738_s24 = sld [smem:[%s5332_s0 + %s4615_s20]]  }
  0x13   :  { %s4743_s30 = sld [smem:[%s5332_s0 + %s4616_s26]]  }
  0x14   :  { %s4748_s6 = sld [smem:[%s5332_s0 + %s4617_s1]]  }
  0x15   :  { %s4753_s12 = sld [smem:[%s5332_s0 + %s4618_s7]]   ;;  %s4622_s7 = smov 18  }
  0x16   :  { %s4758_s20 = sld [smem:[%s5332_s0 + %s4619_s15]]   ;;  %s4623_s15 = smov 19  }
  0x17   :  { %s4763_s27 = sld [smem:[%s5332_s0 + %s4620_s22]]   ;;  %s4624_s22 = smov 20  }
  0x18   :  { %s4768_s4 = sld [smem:[%s5332_s0 + %s4621_s28]]   ;;  %s4625_s28 = smov 21  }
  0x19   :  { %5352 = sst [smem:[#allocation65_spill]] %s4743_s30 }
  0x1a   :  { %s4773_s13 = sld [smem:[%s5332_s0 + %s4622_s7]]   ;;  %s4626_s7 = smov 22  }
  0x1b   :  { %5353 = sst [smem:[#allocation66_spill]] %s4753_s12 }
  0x1c   :  { %s4778_s21 = sld [smem:[%s5332_s0 + %s4623_s15]]   ;;  %s4627_s15 = smov 23  }
  0x1d   :  { %5354 = sst [smem:[#allocation67_spill]] %s4763_s27 }
  0x1e   :  { %s4783_s29 = sld [smem:[%s5332_s0 + %s4624_s22]]   ;;  %s4628_s22 = smov 24  }
  0x1f   :  { %s4788_s5 = sld [smem:[%s5332_s0 + %s4625_s28]]   ;;  %s4629_s28 = smov 25  }
  0x20   :  { %5355 = sst [smem:[#allocation68_spill]] %s4773_s13 }
  0x21   :  { %s4793_s9 = sld [smem:[%s5332_s0 + %s4626_s7]]   ;;  %s4630_s7 = smov 26  }
  0x22   :  { %s4798_s25 = sld [smem:[%s5332_s0 + %s4627_s15]]   ;;  %s4631_s15 = smov 27  }
  0x23   :  { %s4813_s13 = sld [smem:[%s5332_s0 + %s4630_s7]]   ;;  %s4634_s7 = smov 30  }
  0x24   :  { %5356 = sst [smem:[#allocation69_spill]] %s4783_s29 }
  0x25   :  { %5357 = sst [smem:[#allocation70_spill]] %s4788_s5 }
  0x26   :  { %s4803_s29 = sld [smem:[%s5332_s0 + %s4628_s22]]   ;;  %s4632_s22 = smov 28  }
  0x27   :  { %s4808_s5 = sld [smem:[%s5332_s0 + %s4629_s28]]   ;;  %s4633_s28 = smov 29  }
  0x28   :  { %5358 = sst [smem:[#allocation71_spill]] %s4798_s25 }
  0x29   :  { %s4818_s25 = sld [smem:[%s5332_s0 + %s4631_s15]]   ;;  %s4635_s15 = smov 31  }
  0x2a   :  { %s4823_s27 = sld [smem:[%s5332_s0 + %s4632_s22]]   ;;  %s4636_s22 = smov 32  }
  0x2b   :  { %s4833_s12 = sld [smem:[%s5332_s0 + %s4634_s7]]  }
  0x2c   :  { %s4843_s30 = sld [smem:[%s5332_s0 + %s4636_s22]]  }
  0x2d   :  { %5359 = sst [smem:[#allocation72_spill]] %s4808_s5 }
  0x2e   :  { %s4828_s5 = sld [smem:[%s5332_s0 + %s4633_s28]]   ;;  %s4637_s28 = smov 33  }
  0x2f   :  { %5360 = sst [smem:[#allocation73_spill]] %s4818_s25 }
  0x30   :  { %s4838_s25 = sld [smem:[%s5332_s0 + %s4635_s15]]  }
  0x34   :  { %5361 = sst [smem:[#allocation74_spill]] %s4828_s5 }
  0x35   :  { %s4848_s5 = sld [smem:[%s5332_s0 + %s4637_s28]]  }
  0x36   :  { %72 = vsyncpa [#allocation3], 0 }
  0x37   :  { %73 = vsyncpa [#allocation6], 0 }
  0x38   :  { %74 = vsyncpa [#allocation9], 0 }
  0x39   :  { %75 = vsyncpa [#allocation12], 0 }
  0x3a   :  { %76 = vsyncpa [#allocation15], 0 }
  0x3b   :  { %77 = vsyncpa [#allocation18], 0 }
  0x3c   :  { %78 = vsyncpa [#allocation21], 0 }
  0x3d   :  { %79 = vsyncpa [#allocation24], 0 }
  0x3e   :  { %80 = vsyncpa [#allocation27], 0 }
  0x3f   :  { %81 = vsyncpa [#allocation30], 0 }
  0x40   :  { %82 = vsyncpa [#allocation33], 0 }
  0x41   :  { %83 = vsyncpa [#allocation36], 0 }
  0x42   :  { %84 = vsyncpa [#allocation39], 0 }
  0x43   :  { %85 = vsyncpa [#allocation42], 0 }
  0x44   :  { %86 = vsyncpa [#allocation4], 0  ;;  %s4638_s0 = smov [#allocation5]   ;;  %s3981_s10 = scalar_lea.hbm %s4718_s3, 1024 }
  0x45   :  { %s116_s7 = sshll.u32 %s4638_s0, 4  ;;  %p3982_p0 = scmp.ne.s32.totalorder %s4718_s3, %s3981_s10  ;;  %s117_s7 = int_to_ptr.vmem [resolvable:$true] %s116_s7 }
  0x46   :  { %p3985_p1 = scmp.lt.u32.totalorder %s3981_s10, %s4718_s3 }
  0x48   :  { %p3987_p2 = pnand %p3985_p1, %p3982_p0 }
  0x4a   :  { %3990 = shalt.err (!%p3987_p2)
}
  0x4b   :  { %s3991_s11 = scalar_lea.vmem %s117_s7, 1024  ;;  %p3996_p4 = scmp.lt.s32.totalorder %s117_s7, %s117_s7 }
  0x4c   :  { %p3992_p3 = scmp.ne.s32.totalorder %s117_s7, %s3991_s11  ;;  %p3997_p5 = scmp.lt.s32.totalorder %s3991_s11, %s3991_s11 }
  0x4e   :  { %p3998_p6 = por %p3997_p5, %p3996_p4 }
  0x50   :  { %p3999_p7 = pnand %p3998_p6, %p3992_p3 }
  0x52   :  { %4002 = shalt.err (!%p3999_p7)
}
  0x53   :  { %s4639_s15 = smov 64   ;;  %s4640_s16 = smov 4  }
  0x54   :  { %122 = dma.hbm_to_vmem [thread:$0]  %s4718_s3, 1024, %s117_s7, [#allocation6], %s4639_s15, %s4639_s15, %s4640_s16  }
  0x55   :  { %s4641_s18 = smov [#allocation8]   ;;  %s4642_s23 = smov [#allocation11]  }
  0x56   :  { %s138_s22 = sshll.u32 %s4641_s18, 4  ;;  %s160_s26 = sshll.u32 %s4642_s23, 4  ;;  %s139_s22 = int_to_ptr.vmem [resolvable:$true] %s138_s22  ;;  %s161_s26 = int_to_ptr.vmem [resolvable:$true] %s160_s26 }
  0x57   :  { %s4003_s28 = scalar_lea.hbm %s4728_s14, 1024 }
  0x58   :  { %p4004_p8 = scmp.ne.s32.totalorder %s4728_s14, %s4003_s28  ;;  %p4007_p9 = scmp.lt.u32.totalorder %s4003_s28, %s4728_s14 }
  0x5a   :  { %p4009_p10 = pnand %p4007_p9, %p4004_p8 }
  0x5c   :  { %4012 = shalt.err (!%p4009_p10)
}
  0x5d   :  { %s4013_s1 = scalar_lea.vmem %s139_s22, 1024  ;;  %p4018_p12 = scmp.lt.s32.totalorder %s139_s22, %s139_s22 }
  0x5e   :  { %p4014_p11 = scmp.ne.s32.totalorder %s139_s22, %s4013_s1  ;;  %p4019_p13 = scmp.lt.s32.totalorder %s4013_s1, %s4013_s1 }
  0x60   :  { %p4020_p0 = por %p4019_p13, %p4018_p12 }
  0x62   :  { %p4021_p1 = pnand %p4020_p0, %p4014_p11 }
  0x64   :  { %4024 = shalt.err (!%p4021_p1)
}
  0x65   :  { %144 = dma.hbm_to_vmem [thread:$0]  %s4728_s14, 1024, %s139_s22, [#allocation9], %s4639_s15, %s4639_s15, %s4640_s16  }
  0x66   :  { %s4025_s3 = scalar_lea.hbm %s4738_s24, 1024 }
  0x67   :  { %p4026_p2 = scmp.ne.s32.totalorder %s4738_s24, %s4025_s3  ;;  %p4029_p3 = scmp.lt.u32.totalorder %s4025_s3, %s4738_s24 }
  0x69   :  { %p4031_p4 = pnand %p4029_p3, %p4026_p2 }
  0x6b   :  { %4034 = shalt.err (!%p4031_p4)
}
  0x6c   :  { %s4035_s2 = scalar_lea.vmem %s161_s26, 1024  ;;  %p4040_p6 = scmp.lt.s32.totalorder %s161_s26, %s161_s26 }
  0x6d   :  { %p4036_p5 = scmp.ne.s32.totalorder %s161_s26, %s4035_s2  ;;  %p4041_p7 = scmp.lt.s32.totalorder %s4035_s2, %s4035_s2 }
  0x6f   :  { %p4042_p8 = por %p4041_p7, %p4040_p6 }
  0x71   :  { %p4043_p9 = pnand %p4042_p8, %p4036_p5 }
  0x73   :  { %4046 = shalt.err (!%p4043_p9)
}
  0x74   :  { %166 = dma.hbm_to_vmem [thread:$0]  %s4738_s24, 1024, %s161_s26, [#allocation12], %s4639_s15, %s4639_s15, %s4640_s16  }
  0x75   :  { %s4643_s14 = smov [#allocation14]   ;;  %s4644_s7 = smov [#allocation17]  }
  0x76   :  { %s182_s0 = sshll.u32 %s4643_s14, 4  ;;  %s204_s10 = sshll.u32 %s4644_s7, 4  ;;  %s183_s0 = int_to_ptr.vmem [resolvable:$true] %s182_s0  ;;  %s205_s10 = int_to_ptr.vmem [resolvable:$true] %s204_s10 }
  0x77   :  { %s4047_s11 = scalar_lea.hbm %s4748_s6, 1024 }
  0x78   :  { %p4048_p10 = scmp.ne.s32.totalorder %s4748_s6, %s4047_s11  ;;  %p4051_p11 = scmp.lt.u32.totalorder %s4047_s11, %s4748_s6 }
  0x7a   :  { %p4053_p12 = pnand %p4051_p11, %p4048_p10 }
  0x7c   :  { %4056 = shalt.err (!%p4053_p12)
}
  0x7d   :  { %s4057_s18 = scalar_lea.vmem %s183_s0, 1024  ;;  %p4062_p0 = scmp.lt.s32.totalorder %s183_s0, %s183_s0 }
  0x7e   :  { %p4058_p13 = scmp.ne.s32.totalorder %s183_s0, %s4057_s18  ;;  %p4063_p1 = scmp.lt.s32.totalorder %s4057_s18, %s4057_s18 }
  0x80   :  { %p4064_p2 = por %p4063_p1, %p4062_p0 }
  0x82   :  { %p4065_p3 = pnand %p4064_p2, %p4058_p13 }
  0x84   :  { %4068 = shalt.err (!%p4065_p3)
}
  0x85   :  { %188 = dma.hbm_to_vmem [thread:$0]  %s4748_s6, 1024, %s183_s0, [#allocation15], %s4639_s15, %s4639_s15, %s4640_s16  }
  0x86   :  { %s4069_s24 = scalar_lea.hbm %s4758_s20, 1024 }
  0x87   :  { %p4070_p4 = scmp.ne.s32.totalorder %s4758_s20, %s4069_s24  ;;  %p4073_p5 = scmp.lt.u32.totalorder %s4069_s24, %s4758_s20 }
  0x89   :  { %p4075_p6 = pnand %p4073_p5, %p4070_p4 }
  0x8b   :  { %4078 = shalt.err (!%p4075_p6)
}
  0x8c   :  { %s4079_s22 = scalar_lea.vmem %s205_s10, 1024  ;;  %p4084_p8 = scmp.lt.s32.totalorder %s205_s10, %s205_s10 }
  0x8d   :  { %p4080_p7 = scmp.ne.s32.totalorder %s205_s10, %s4079_s22  ;;  %p4085_p9 = scmp.lt.s32.totalorder %s4079_s22, %s4079_s22 }
  0x8f   :  { %p4086_p10 = por %p4085_p9, %p4084_p8 }
  0x91   :  { %p4087_p11 = pnand %p4086_p10, %p4080_p7 }
  0x93   :  { %4090 = shalt.err (!%p4087_p11)
}
  0x94   :  { %210 = dma.hbm_to_vmem [thread:$0]  %s4758_s20, 1024, %s205_s10, [#allocation18], %s4639_s15, %s4639_s15, %s4640_s16  }
  0x95   :  { %s4645_s6 = smov [#allocation20]   ;;  %s4646_s26 = smov [#allocation23]  }
  0x96   :  { %s226_s23 = sshll.u32 %s4645_s6, 4  ;;  %s248_s28 = sshll.u32 %s4646_s26, 4  ;;  %s227_s23 = int_to_ptr.vmem [resolvable:$true] %s226_s23  ;;  %s249_s28 = int_to_ptr.vmem [resolvable:$true] %s248_s28 }
  0x97   :  { %s4091_s1 = scalar_lea.hbm %s4768_s4, 1024 }
  0x98   :  { %p4092_p12 = scmp.ne.s32.totalorder %s4768_s4, %s4091_s1  ;;  %p4095_p13 = scmp.lt.u32.totalorder %s4091_s1, %s4768_s4 }
  0x9a   :  { %p4097_p0 = pnand %p4095_p13, %p4092_p12 }
  0x9c   :  { %4100 = shalt.err (!%p4097_p0)
}
  0x9d   :  { %s4101_s3 = scalar_lea.vmem %s227_s23, 1024  ;;  %p4106_p2 = scmp.lt.s32.totalorder %s227_s23, %s227_s23 }
  0x9e   :  { %p4102_p1 = scmp.ne.s32.totalorder %s227_s23, %s4101_s3  ;;  %p4107_p3 = scmp.lt.s32.totalorder %s4101_s3, %s4101_s3 }
  0xa0   :  { %p4108_p4 = por %p4107_p3, %p4106_p2 }
  0xa2   :  { %p4109_p5 = pnand %p4108_p4, %p4102_p1 }
  0xa4   :  { %4112 = shalt.err (!%p4109_p5)
}
  0xa5   :  { %232 = dma.hbm_to_vmem [thread:$0]  %s4768_s4, 1024, %s227_s23, [#allocation21], %s4639_s15, %s4639_s15, %s4640_s16  }
  0xa6   :  { %s4113_s20 = scalar_lea.hbm %s4778_s21, 3072 }
  0xa7   :  { %p4114_p6 = scmp.ne.s32.totalorder %s4778_s21, %s4113_s20  ;;  %p4117_p7 = scmp.lt.u32.totalorder %s4113_s20, %s4778_s21 }
  0xa9   :  { %p4119_p8 = pnand %p4117_p7, %p4114_p6 }
  0xab   :  { %4122 = shalt.err (!%p4119_p8)
}
  0xac   :  { %s4123_s2 = scalar_lea.vmem %s249_s28, 3072  ;;  %p4128_p10 = scmp.lt.s32.totalorder %s249_s28, %s249_s28 }
  0xad   :  { %p4124_p9 = scmp.ne.s32.totalorder %s249_s28, %s4123_s2  ;;  %p4129_p11 = scmp.lt.s32.totalorder %s4123_s2, %s4123_s2 }
  0xaf   :  { %p4130_p12 = por %p4129_p11, %p4128_p10 }
  0xb1   :  { %p4131_p13 = pnand %p4130_p12, %p4124_p9 }
  0xb3   :  { %4134 = shalt.err (!%p4131_p13)
}
  0xb4   :  { %s4647_s14 = smov 192   ;;  %s4648_s0 = smov 12  }
  0xb5   :  { %254 = dma.hbm_to_vmem [thread:$0]  %s4778_s21, 3072, %s249_s28, [#allocation24], %s4647_s14, %s4647_s14, %s4648_s0  }
  0xb6   :  { %s4649_s4 = smov [#allocation26]   ;;  %s4650_s10 = smov [#allocation29]  }
  0xb7   :  { %s275_s7 = sshll.u32 %s4649_s4, 4  ;;  %s297_s11 = sshll.u32 %s4650_s10, 4  ;;  %s276_s7 = int_to_ptr.vmem [resolvable:$true] %s275_s7  ;;  %s298_s11 = int_to_ptr.vmem [resolvable:$true] %s297_s11 }
  0xb8   :  { %s4135_s18 = scalar_lea.hbm %s4793_s9, 16 }
  0xb9   :  { %p4136_p0 = scmp.ne.s32.totalorder %s4793_s9, %s4135_s18  ;;  %p4139_p1 = scmp.lt.u32.totalorder %s4135_s18, %s4793_s9 }
  0xbb   :  { %p4141_p2 = pnand %p4139_p1, %p4136_p0 }
  0xbd   :  { %4144 = shalt.err (!%p4141_p2)
}
  0xbe   :  { %s4145_s24 = scalar_lea.vmem %s276_s7, 16  ;;  %s4149_s22 = scalar_lea.vmem %s276_s7, 32 }
  0xbf   :  { %p4146_p3 = scmp.ne.s32.totalorder %s276_s7, %s4145_s24  ;;  %p4150_p4 = scmp.lt.s32.totalorder %s276_s7, %s276_s7 }
  0xc0   :  { %p4151_p5 = scmp.lt.s32.totalorder %s4149_s22, %s4145_s24 }
  0xc2   :  { %p4152_p6 = por %p4151_p5, %p4150_p4 }
  0xc4   :  { %p4153_p7 = pnand %p4152_p6, %p4146_p3 }
  0xc6   :  { %4156 = shalt.err (!%p4153_p7)
}
  0xc7   :  { %278 = dma.hbm_to_vmem [thread:$0]  %s4793_s9, 16, %s276_s7, [#allocation27]  }
  0xc8   :  { %s4157_s21 = scalar_lea.hbm %s4803_s29, 16 }
  0xc9   :  { %p4158_p8 = scmp.ne.s32.totalorder %s4803_s29, %s4157_s21  ;;  %p4161_p9 = scmp.lt.u32.totalorder %s4157_s21, %s4803_s29 }
  0xcb   :  { %p4163_p10 = pnand %p4161_p9, %p4158_p8 }
  0xcd   :  { %4166 = shalt.err (!%p4163_p10)
}
  0xce   :  { %s4167_s6 = scalar_lea.vmem %s298_s11, 16  ;;  %s4171_s23 = scalar_lea.vmem %s298_s11, 32 }
  0xcf   :  { %p4168_p11 = scmp.ne.s32.totalorder %s298_s11, %s4167_s6  ;;  %p4172_p12 = scmp.lt.s32.totalorder %s298_s11, %s298_s11 }
  0xd0   :  { %p4173_p13 = scmp.lt.s32.totalorder %s4171_s23, %s4167_s6 }
  0xd2   :  { %p4174_p0 = por %p4173_p13, %p4172_p12 }
  0xd4   :  { %p4175_p1 = pnand %p4174_p0, %p4168_p11 }
  0xd6   :  { %4178 = shalt.err (!%p4175_p1)
}
  0xd7   :  { %300 = dma.hbm_to_vmem [thread:$0]  %s4803_s29, 16, %s298_s11, [#allocation30]  }
  0xd8   :  { %s4651_s9 = smov [#allocation32]   ;;  %s4652_s28 = smov [#allocation35]  }
  0xd9   :  { %s319_s26 = sshll.u32 %s4651_s9, 4  ;;  %s341_s1 = sshll.u32 %s4652_s28, 4  ;;  %s320_s26 = int_to_ptr.vmem [resolvable:$true] %s319_s26  ;;  %s342_s1 = int_to_ptr.vmem [resolvable:$true] %s341_s1 }
  0xda   :  { %s4179_s3 = scalar_lea.hbm %s4813_s13, 16 }
  0xdb   :  { %p4180_p2 = scmp.ne.s32.totalorder %s4813_s13, %s4179_s3  ;;  %p4183_p3 = scmp.lt.u32.totalorder %s4179_s3, %s4813_s13 }
  0xdd   :  { %p4185_p4 = pnand %p4183_p3, %p4180_p2 }
  0xdf   :  { %4188 = shalt.err (!%p4185_p4)
}
  0xe0   :  { %s4189_s20 = scalar_lea.vmem %s320_s26, 16  ;;  %s4193_s2 = scalar_lea.vmem %s320_s26, 32 }
  0xe1   :  { %p4190_p5 = scmp.ne.s32.totalorder %s320_s26, %s4189_s20  ;;  %p4194_p6 = scmp.lt.s32.totalorder %s320_s26, %s320_s26 }
  0xe2   :  { %p4195_p7 = scmp.lt.s32.totalorder %s4193_s2, %s4189_s20 }
  0xe4   :  { %p4196_p8 = por %p4195_p7, %p4194_p6 }
  0xe6   :  { %p4197_p9 = pnand %p4196_p8, %p4190_p5 }
  0xe8   :  { %4200 = shalt.err (!%p4197_p9)
}
  0xe9   :  { %322 = dma.hbm_to_vmem [thread:$0]  %s4813_s13, 16, %s320_s26, [#allocation33]  }
  0xea   :  { %s4201_s29 = scalar_lea.hbm %s4823_s27, 16 }
  0xeb   :  { %p4202_p10 = scmp.ne.s32.totalorder %s4823_s27, %s4201_s29  ;;  %p4205_p11 = scmp.lt.u32.totalorder %s4201_s29, %s4823_s27 }
  0xed   :  { %p4207_p12 = pnand %p4205_p11, %p4202_p10 }
  0xef   :  { %4210 = shalt.err (!%p4207_p12)
}
  0xf0   :  { %s4211_s14 = scalar_lea.vmem %s342_s1, 16  ;;  %s4215_s0 = scalar_lea.vmem %s342_s1, 32 }
  0xf1   :  { %p4212_p13 = scmp.ne.s32.totalorder %s342_s1, %s4211_s14  ;;  %p4216_p0 = scmp.lt.s32.totalorder %s342_s1, %s342_s1 }
  0xf2   :  { %p4217_p1 = scmp.lt.s32.totalorder %s4215_s0, %s4211_s14 }
  0xf4   :  { %p4218_p2 = por %p4217_p1, %p4216_p0 }
  0xf6   :  { %p4219_p3 = pnand %p4218_p2, %p4212_p13 }
  0xf8   :  { %4222 = shalt.err (!%p4219_p3)
}
  0xf9   :  { %344 = dma.hbm_to_vmem [thread:$0]  %s4823_s27, 16, %s342_s1, [#allocation36]  }
  0xfa   :  { %s4653_s13 = smov [#allocation38]   ;;  %s4654_s7 = smov [#allocation2]  }
  0xfb   :  { %s363_s4 = sshll.u32 %s4653_s13, 4  ;;  %s98_s10 = sshll.u32 %s4654_s7, 4  ;;  %s364_s4 = int_to_ptr.vmem [resolvable:$true] %s363_s4  ;;  %s99_s10 = int_to_ptr.vmem [resolvable:$true] %s98_s10 }
  0xfc   :  { %s4223_s11 = scalar_lea.hbm %s4833_s12, 16 }
  0xfd   :  { %p4224_p4 = scmp.ne.s32.totalorder %s4833_s12, %s4223_s11  ;;  %p4227_p5 = scmp.lt.u32.totalorder %s4223_s11, %s4833_s12 }
  0xff   :  { %p4229_p6 = pnand %p4227_p5, %p4224_p4 }
 0x101   :  { %4232 = shalt.err (!%p4229_p6)
}
 0x102   :  { %s4233_s18 = scalar_lea.vmem %s364_s4, 16  ;;  %s4237_s24 = scalar_lea.vmem %s364_s4, 32 }
 0x103   :  { %p4234_p7 = scmp.ne.s32.totalorder %s364_s4, %s4233_s18  ;;  %p4238_p8 = scmp.lt.s32.totalorder %s364_s4, %s364_s4 }
 0x104   :  { %p4239_p9 = scmp.lt.s32.totalorder %s4237_s24, %s4233_s18 }
 0x106   :  { %p4240_p10 = por %p4239_p9, %p4238_p8 }
 0x108   :  { %p4241_p11 = pnand %p4240_p10, %p4234_p7 }
 0x10a   :  { %4244 = shalt.err (!%p4241_p11)
}
 0x10b   :  { %366 = dma.hbm_to_vmem [thread:$0]  %s4833_s12, 16, %s364_s4, [#allocation39]  }
 0x10c   :  { %s4245_s27 = scalar_lea.hbm %s4698_s17, 256 }
 0x10d   :  { %p4246_p12 = scmp.ne.s32.totalorder %s4698_s17, %s4245_s27  ;;  %p4249_p13 = scmp.lt.u32.totalorder %s4245_s27, %s4698_s17 }
 0x10f   :  { %p4251_p0 = pnand %p4249_p13, %p4246_p12 }
 0x111   :  { %4254 = shalt.err (!%p4251_p0)
}
 0x112   :  { %s4255_s22 = scalar_lea.vmem %s99_s10, 256  ;;  %p4260_p2 = scmp.lt.s32.totalorder %s99_s10, %s99_s10 }
 0x113   :  { %p4256_p1 = scmp.ne.s32.totalorder %s99_s10, %s4255_s22  ;;  %p4261_p3 = scmp.lt.s32.totalorder %s4255_s22, %s4255_s22 }
 0x115   :  { %p4262_p4 = por %p4261_p3, %p4260_p2 }
 0x117   :  { %p4263_p5 = pnand %p4262_p4, %p4256_p1 }
 0x119   :  { %4266 = shalt.err (!%p4263_p5)
}
 0x11a   :  { %s4655_s21 = smov 128   ;;  %s4656_s6 = smov 8  }
 0x11b   :  { %104 = dma.hbm_to_vmem [thread:$0]  %s4698_s17, 256, %s99_s10, [#allocation3], %s4655_s21, %s4655_s21, %s4656_s6  }
 0x11c   :  { %s4657_s12 = smov [#allocation7]   ;;  %s4658_s9 = smov [#allocation10]  }
 0x11d   :  { %s129_s23 = sshll.u32 %s4657_s12, 4  ;;  %s151_s26 = sshll.u32 %s4658_s9, 4  ;;  %s130_s23 = int_to_ptr.vmem [resolvable:$true] %s129_s23  ;;  %s152_s26 = int_to_ptr.vmem [resolvable:$true] %s151_s26 }
 0x11e   :  { %s4267_s28 = scalar_lea.hbm %s4723_s8, 16 }
 0x11f   :  { %p4268_p6 = scmp.ne.s32.totalorder %s4723_s8, %s4267_s28  ;;  %p4271_p7 = scmp.lt.u32.totalorder %s4267_s28, %s4723_s8 }
 0x121   :  { %p4273_p8 = pnand %p4271_p7, %p4268_p6 }
 0x123   :  { %4276 = shalt.err (!%p4273_p8)
}
 0x124   :  { %s4277_s1 = scalar_lea.vmem %s130_s23, 16  ;;  %s4281_s3 = scalar_lea.vmem %s130_s23, 32 }
 0x125   :  { %p4278_p9 = scmp.ne.s32.totalorder %s130_s23, %s4277_s1  ;;  %p4282_p10 = scmp.lt.s32.totalorder %s130_s23, %s130_s23 }
 0x126   :  { %p4283_p11 = scmp.lt.s32.totalorder %s4281_s3, %s4277_s1 }
 0x128   :  { %p4284_p12 = por %p4283_p11, %p4282_p10 }
 0x12a   :  { %p4285_p13 = pnand %p4284_p12, %p4278_p9 }
 0x12c   :  { %4288 = shalt.err (!%p4285_p13)
}
 0x12d   :  { %132 = dma.hbm_to_vmem [thread:$0]  %s4723_s8, 16, %s130_s23, [#allocation6]  }
 0x12e   :  { %s4289_s17 = scalar_lea.hbm %s4733_s19, 16 }
 0x12f   :  { %p4290_p0 = scmp.ne.s32.totalorder %s4733_s19, %s4289_s17  ;;  %p4293_p1 = scmp.lt.u32.totalorder %s4289_s17, %s4733_s19 }
 0x131   :  { %p4295_p2 = pnand %p4293_p1, %p4290_p0 }
 0x133   :  { %4298 = shalt.err (!%p4295_p2)
}
 0x134   :  { %s4299_s20 = scalar_lea.vmem %s152_s26, 16  ;;  %s4303_s2 = scalar_lea.vmem %s152_s26, 32 }
 0x135   :  { %p4300_p3 = scmp.ne.s32.totalorder %s152_s26, %s4299_s20  ;;  %p4304_p4 = scmp.lt.s32.totalorder %s152_s26, %s152_s26 }
 0x136   :  { %p4305_p5 = scmp.lt.s32.totalorder %s4303_s2, %s4299_s20 }
 0x138   :  { %p4306_p6 = por %p4305_p5, %p4304_p4 }
 0x13a   :  { %p4307_p7 = pnand %p4306_p6, %p4300_p3 }
 0x13c   :  { %4310 = shalt.err (!%p4307_p7)
}
 0x13d   :  { %s5362_s29 = sld [smem:[#allocation65_spill]]  ;;  %s4659_s8 = smov [#allocation13]  }
 0x13e   :  { %154 = dma.hbm_to_vmem [thread:$0]  %s4733_s19, 16, %s152_s26, [#allocation9]  }
 0x13f   :  { %s173_s14 = sshll.u32 %s4659_s8, 4  ;;  %s4660_s0 = smov [#allocation16]   ;;  %s174_s14 = int_to_ptr.vmem [resolvable:$true] %s173_s14 }
 0x140   :  { %s195_s13 = sshll.u32 %s4660_s0, 4  ;;  %s196_s13 = int_to_ptr.vmem [resolvable:$true] %s195_s13 }
 0x143   :  { %s4311_s4 = scalar_lea.hbm %s5362_s29, 16 }
 0x144   :  { %p4312_p8 = scmp.ne.s32.totalorder %s5362_s29, %s4311_s4  ;;  %p4315_p9 = scmp.lt.u32.totalorder %s4311_s4, %s5362_s29 }
 0x146   :  { %p4317_p10 = pnand %p4315_p9, %p4312_p8 }
 0x148   :  { %4320 = shalt.err (!%p4317_p10)
}
 0x149   :  { %s4321_s7 = scalar_lea.vmem %s174_s14, 16  ;;  %s4325_s10 = scalar_lea.vmem %s174_s14, 32 }
 0x14a   :  { %p4322_p11 = scmp.ne.s32.totalorder %s174_s14, %s4321_s7  ;;  %p4326_p12 = scmp.lt.s32.totalorder %s174_s14, %s174_s14 }
 0x14b   :  { %p4327_p13 = scmp.lt.s32.totalorder %s4325_s10, %s4321_s7 }
 0x14d   :  { %p4328_p0 = por %p4327_p13, %p4326_p12 }
 0x14f   :  { %p4329_p1 = pnand %p4328_p0, %p4322_p11 }
 0x151   :  { %4332 = shalt.err (!%p4329_p1)
}
 0x152   :  { %s5363_s19 = sld [smem:[#allocation66_spill]] }
 0x153   :  { %176 = dma.hbm_to_vmem [thread:$0]  %s5362_s29, 16, %s174_s14, [#allocation12]  }
 0x158   :  { %s4333_s11 = scalar_lea.hbm %s5363_s19, 16 }
 0x159   :  { %p4334_p2 = scmp.ne.s32.totalorder %s5363_s19, %s4333_s11  ;;  %p4337_p3 = scmp.lt.u32.totalorder %s4333_s11, %s5363_s19 }
 0x15b   :  { %p4339_p4 = pnand %p4337_p3, %p4334_p2 }
 0x15d   :  { %4342 = shalt.err (!%p4339_p4)
}
 0x15e   :  { %s4343_s18 = scalar_lea.vmem %s196_s13, 16  ;;  %s4347_s24 = scalar_lea.vmem %s196_s13, 32 }
 0x15f   :  { %p4344_p5 = scmp.ne.s32.totalorder %s196_s13, %s4343_s18  ;;  %p4348_p6 = scmp.lt.s32.totalorder %s196_s13, %s196_s13 }
 0x160   :  { %p4349_p7 = scmp.lt.s32.totalorder %s4347_s24, %s4343_s18 }
 0x162   :  { %p4350_p8 = por %p4349_p7, %p4348_p6 }
 0x164   :  { %p4351_p9 = pnand %p4350_p8, %p4344_p5 }
 0x166   :  { %4354 = shalt.err (!%p4351_p9)
}
 0x167   :  { %s5364_s27 = sld [smem:[#allocation67_spill]]  ;;  %s4661_s22 = smov [#allocation19]  }
 0x168   :  { %198 = dma.hbm_to_vmem [thread:$0]  %s5363_s19, 16, %s196_s13, [#allocation15]  }
 0x169   :  { %s217_s12 = sshll.u32 %s4661_s22, 4  ;;  %s4662_s23 = smov [#allocation22]   ;;  %s218_s12 = int_to_ptr.vmem [resolvable:$true] %s217_s12 }
 0x16a   :  { %s239_s9 = sshll.u32 %s4662_s23, 4  ;;  %s240_s9 = int_to_ptr.vmem [resolvable:$true] %s239_s9 }
 0x16d   :  { %s4355_s26 = scalar_lea.hbm %s5364_s27, 16 }
 0x16e   :  { %p4356_p10 = scmp.ne.s32.totalorder %s5364_s27, %s4355_s26  ;;  %p4359_p11 = scmp.lt.u32.totalorder %s4355_s26, %s5364_s27 }
 0x170   :  { %p4361_p12 = pnand %p4359_p11, %p4356_p10 }
 0x172   :  { %4364 = shalt.err (!%p4361_p12)
}
 0x173   :  { %s4365_s28 = scalar_lea.vmem %s218_s12, 16  ;;  %s4369_s1 = scalar_lea.vmem %s218_s12, 32 }
 0x174   :  { %p4366_p13 = scmp.ne.s32.totalorder %s218_s12, %s4365_s28  ;;  %p4370_p0 = scmp.lt.s32.totalorder %s218_s12, %s218_s12 }
 0x175   :  { %p4371_p1 = scmp.lt.s32.totalorder %s4369_s1, %s4365_s28 }
 0x177   :  { %p4372_p2 = por %p4371_p1, %p4370_p0 }
 0x179   :  { %p4373_p3 = pnand %p4372_p2, %p4366_p13 }
 0x17b   :  { %4376 = shalt.err (!%p4373_p3)
}
 0x17c   :  { %s5365_s3 = sld [smem:[#allocation68_spill]] }
 0x17d   :  { %220 = dma.hbm_to_vmem [thread:$0]  %s5364_s27, 16, %s218_s12, [#allocation18]  }
 0x182   :  { %s4377_s17 = scalar_lea.hbm %s5365_s3, 16 }
 0x183   :  { %p4378_p4 = scmp.ne.s32.totalorder %s5365_s3, %s4377_s17  ;;  %p4381_p5 = scmp.lt.u32.totalorder %s4377_s17, %s5365_s3 }
 0x185   :  { %p4383_p6 = pnand %p4381_p5, %p4378_p4 }
 0x187   :  { %4386 = shalt.err (!%p4383_p6)
}
 0x188   :  { %s4387_s20 = scalar_lea.vmem %s240_s9, 16  ;;  %s4391_s2 = scalar_lea.vmem %s240_s9, 32 }
 0x189   :  { %p4388_p7 = scmp.ne.s32.totalorder %s240_s9, %s4387_s20  ;;  %p4392_p8 = scmp.lt.s32.totalorder %s240_s9, %s240_s9 }
 0x18a   :  { %p4393_p9 = scmp.lt.s32.totalorder %s4391_s2, %s4387_s20 }
 0x18c   :  { %p4394_p10 = por %p4393_p9, %p4392_p8 }
 0x18e   :  { %p4395_p11 = pnand %p4394_p10, %p4388_p7 }
 0x190   :  { %4398 = shalt.err (!%p4395_p11)
}
 0x191   :  { %s5366_s29 = sld [smem:[#allocation70_spill]]  ;;  %s4663_s8 = smov [#allocation25]  }
 0x192   :  { %242 = dma.hbm_to_vmem [thread:$0]  %s5365_s3, 16, %s240_s9, [#allocation21]  }
 0x193   :  { %s262_s14 = sshll.u32 %s4663_s8, 4  ;;  %s4664_s0 = smov [#allocation28]   ;;  %s263_s14 = int_to_ptr.vmem [resolvable:$true] %s262_s14 }
 0x194   :  { %s284_s13 = sshll.u32 %s4664_s0, 4  ;;  %s285_s13 = int_to_ptr.vmem [resolvable:$true] %s284_s13 }
 0x197   :  { %s4399_s4 = scalar_lea.hbm %s5366_s29, 1024 }
 0x198   :  { %p4400_p12 = scmp.ne.s32.totalorder %s5366_s29, %s4399_s4  ;;  %p4403_p13 = scmp.lt.u32.totalorder %s4399_s4, %s5366_s29 }
 0x19a   :  { %p4405_p0 = pnand %p4403_p13, %p4400_p12 }
 0x19c   :  { %4408 = shalt.err (!%p4405_p0)
}
 0x19d   :  { %s4409_s7 = scalar_lea.vmem %s263_s14, 1024  ;;  %p4414_p2 = scmp.lt.s32.totalorder %s263_s14, %s263_s14 }
 0x19e   :  { %p4410_p1 = scmp.ne.s32.totalorder %s263_s14, %s4409_s7  ;;  %p4415_p3 = scmp.lt.s32.totalorder %s4409_s7, %s4409_s7 }
 0x1a0   :  { %p4416_p4 = por %p4415_p3, %p4414_p2 }
 0x1a2   :  { %p4417_p5 = pnand %p4416_p4, %p4410_p1 }
 0x1a4   :  { %4420 = shalt.err (!%p4417_p5)
}
 0x1a5   :  { %s5367_s10 = sld [smem:[#allocation71_spill]] }
 0x1a6   :  { %268 = dma.hbm_to_vmem [thread:$0]  %s5366_s29, 1024, %s263_s14, [#allocation24], %s4639_s15, %s4639_s15, %s4640_s16  }
 0x1ab   :  { %s4421_s19 = scalar_lea.hbm %s5367_s10, 1024 }
 0x1ac   :  { %p4422_p6 = scmp.ne.s32.totalorder %s5367_s10, %s4421_s19  ;;  %p4425_p7 = scmp.lt.u32.totalorder %s4421_s19, %s5367_s10 }
 0x1ae   :  { %p4427_p8 = pnand %p4425_p7, %p4422_p6 }
 0x1b0   :  { %4430 = shalt.err (!%p4427_p8)
}
 0x1b1   :  { %s4431_s11 = scalar_lea.vmem %s285_s13, 1024  ;;  %p4436_p10 = scmp.lt.s32.totalorder %s285_s13, %s285_s13 }
 0x1b2   :  { %p4432_p9 = scmp.ne.s32.totalorder %s285_s13, %s4431_s11  ;;  %p4437_p11 = scmp.lt.s32.totalorder %s4431_s11, %s4431_s11 }
 0x1b4   :  { %p4438_p12 = por %p4437_p11, %p4436_p10 }
 0x1b6   :  { %p4439_p13 = pnand %p4438_p12, %p4432_p9 }
 0x1b8   :  { %4442 = shalt.err (!%p4439_p13)
}
 0x1b9   :  { %s5368_s18 = sld [smem:[#allocation72_spill]]  ;;  %s4665_s24 = smov [#allocation31]  }
 0x1ba   :  { %290 = dma.hbm_to_vmem [thread:$0]  %s5367_s10, 1024, %s285_s13, [#allocation27], %s4639_s15, %s4639_s15, %s4640_s16  }
 0x1bb   :  { %s306_s27 = sshll.u32 %s4665_s24, 4  ;;  %s4666_s22 = smov [#allocation34]   ;;  %s307_s27 = int_to_ptr.vmem [resolvable:$true] %s306_s27 }
 0x1bc   :  { %s328_s12 = sshll.u32 %s4666_s22, 4  ;;  %s329_s12 = int_to_ptr.vmem [resolvable:$true] %s328_s12 }
 0x1bf   :  { %s4443_s23 = scalar_lea.hbm %s5368_s18, 1024 }
 0x1c0   :  { %p4444_p0 = scmp.ne.s32.totalorder %s5368_s18, %s4443_s23  ;;  %p4447_p1 = scmp.lt.u32.totalorder %s4443_s23, %s5368_s18 }
 0x1c2   :  { %p4449_p2 = pnand %p4447_p1, %p4444_p0 }
 0x1c4   :  { %4452 = shalt.err (!%p4449_p2)
}
 0x1c5   :  { %s4453_s9 = scalar_lea.vmem %s307_s27, 1024  ;;  %p4458_p4 = scmp.lt.s32.totalorder %s307_s27, %s307_s27 }
 0x1c6   :  { %p4454_p3 = scmp.ne.s32.totalorder %s307_s27, %s4453_s9  ;;  %p4459_p5 = scmp.lt.s32.totalorder %s4453_s9, %s4453_s9 }
 0x1c8   :  { %p4460_p6 = por %p4459_p5, %p4458_p4 }
 0x1ca   :  { %p4461_p7 = pnand %p4460_p6, %p4454_p3 }
 0x1cc   :  { %4464 = shalt.err (!%p4461_p7)
}
 0x1cd   :  { %s5369_s26 = sld [smem:[#allocation73_spill]] }
 0x1ce   :  { %312 = dma.hbm_to_vmem [thread:$0]  %s5368_s18, 1024, %s307_s27, [#allocation30], %s4639_s15, %s4639_s15, %s4640_s16  }
 0x1d3   :  { %s4465_s28 = scalar_lea.hbm %s5369_s26, 1024 }
 0x1d4   :  { %p4466_p8 = scmp.ne.s32.totalorder %s5369_s26, %s4465_s28  ;;  %p4469_p9 = scmp.lt.u32.totalorder %s4465_s28, %s5369_s26 }
 0x1d6   :  { %p4471_p10 = pnand %p4469_p9, %p4466_p8 }
 0x1d8   :  { %4474 = shalt.err (!%p4471_p10)
}
 0x1d9   :  { %s4475_s1 = scalar_lea.vmem %s329_s12, 1024  ;;  %p4480_p12 = scmp.lt.s32.totalorder %s329_s12, %s329_s12 }
 0x1da   :  { %p4476_p11 = scmp.ne.s32.totalorder %s329_s12, %s4475_s1  ;;  %p4481_p13 = scmp.lt.s32.totalorder %s4475_s1, %s4475_s1 }
 0x1dc   :  { %p4482_p0 = por %p4481_p13, %p4480_p12 }
 0x1de   :  { %p4483_p1 = pnand %p4482_p0, %p4476_p11 }
 0x1e0   :  { %4486 = shalt.err (!%p4483_p1)
}
 0x1e1   :  { %s5370_s3 = sld [smem:[#allocation74_spill]]  ;;  %s4667_s17 = smov [#allocation37]  }
 0x1e2   :  { %334 = dma.hbm_to_vmem [thread:$0]  %s5369_s26, 1024, %s329_s12, [#allocation33], %s4639_s15, %s4639_s15, %s4640_s16  }
 0x1e3   :  { %s350_s20 = sshll.u32 %s4667_s17, 4  ;;  %s4668_s2 = smov [#allocation40]   ;;  %s351_s20 = int_to_ptr.vmem [resolvable:$true] %s350_s20 }
 0x1e4   :  { %s372_s29 = sshll.u32 %s4668_s2, 4  ;;  %s373_s29 = int_to_ptr.vmem [resolvable:$true] %s372_s29 }
 0x1e7   :  { %s4487_s8 = scalar_lea.hbm %s5370_s3, 1024 }
 0x1e8   :  { %p4488_p2 = scmp.ne.s32.totalorder %s5370_s3, %s4487_s8  ;;  %p4491_p3 = scmp.lt.u32.totalorder %s4487_s8, %s5370_s3 }
 0x1ea   :  { %p4493_p4 = pnand %p4491_p3, %p4488_p2 }
 0x1ec   :  { %4496 = shalt.err (!%p4493_p4)
}
 0x1ed   :  { %s4497_s14 = scalar_lea.vmem %s351_s20, 1024  ;;  %p4502_p6 = scmp.lt.s32.totalorder %s351_s20, %s351_s20 }
 0x1ee   :  { %p4498_p5 = scmp.ne.s32.totalorder %s351_s20, %s4497_s14  ;;  %p4503_p7 = scmp.lt.s32.totalorder %s4497_s14, %s4497_s14 }
 0x1f0   :  { %p4504_p8 = por %p4503_p7, %p4502_p6 }
 0x1f2   :  { %p4505_p9 = pnand %p4504_p8, %p4498_p5 }
 0x1f4   :  { %4508 = shalt.err (!%p4505_p9)
}
 0x1f5   :  { %356 = dma.hbm_to_vmem [thread:$0]  %s5370_s3, 1024, %s351_s20, [#allocation36], %s4639_s15, %s4639_s15, %s4640_s16  }
 0x1f6   :  { %s4509_s0 = scalar_lea.hbm %s4838_s25, 1024 }
 0x1f7   :  { %p4510_p10 = scmp.ne.s32.totalorder %s4838_s25, %s4509_s0  ;;  %p4513_p11 = scmp.lt.u32.totalorder %s4509_s0, %s4838_s25 }
 0x1f9   :  { %p4515_p12 = pnand %p4513_p11, %p4510_p10 }
 0x1fb   :  { %4518 = shalt.err (!%p4515_p12)
}
 0x1fc   :  { %s4519_s13 = scalar_lea.vmem %s373_s29, 1024  ;;  %p4524_p0 = scmp.lt.s32.totalorder %s373_s29, %s373_s29 }
 0x1fd   :  { %p4520_p13 = scmp.ne.s32.totalorder %s373_s29, %s4519_s13  ;;  %p4525_p1 = scmp.lt.s32.totalorder %s4519_s13, %s4519_s13 }
 0x1ff   :  { %p4526_p2 = por %p4525_p1, %p4524_p0 }
 0x201   :  { %p4527_p3 = pnand %p4526_p2, %p4520_p13 }
 0x203   :  { %4530 = shalt.err (!%p4527_p3)
}
 0x204   :  { %378 = dma.hbm_to_vmem [thread:$0]  %s4838_s25, 1024, %s373_s29, [#allocation39], %s4639_s15, %s4639_s15, %s4640_s16  }
 0x205   :  { %s4669_s4 = smov [#allocation41]   ;;  %s4531_s10 = scalar_lea.hbm %s4843_s30, 16 }
 0x206   :  { %s385_s7 = sshll.u32 %s4669_s4, 4  ;;  %p4532_p4 = scmp.ne.s32.totalorder %s4843_s30, %s4531_s10  ;;  %s386_s7 = int_to_ptr.vmem [resolvable:$true] %s385_s7 }
 0x207   :  { %p4535_p5 = scmp.lt.u32.totalorder %s4531_s10, %s4843_s30 }
 0x209   :  { %p4537_p6 = pnand %p4535_p5, %p4532_p4 }
 0x20b   :  { %4540 = shalt.err (!%p4537_p6)
}
 0x20c   :  { %s4541_s19 = scalar_lea.vmem %s386_s7, 16  ;;  %s4545_s11 = scalar_lea.vmem %s386_s7, 32 }
 0x20d   :  { %p4542_p7 = scmp.ne.s32.totalorder %s386_s7, %s4541_s19  ;;  %p4546_p8 = scmp.lt.s32.totalorder %s386_s7, %s386_s7 }
 0x20e   :  { %p4547_p9 = scmp.lt.s32.totalorder %s4545_s11, %s4541_s19 }
 0x210   :  { %p4548_p10 = por %p4547_p9, %p4546_p8 }
 0x212   :  { %p4549_p11 = pnand %p4548_p10, %p4542_p7 }
 0x214   :  { %4552 = shalt.err (!%p4549_p11)
}
 0x215   :  { %388 = dma.hbm_to_vmem [thread:$0]  %s4843_s30, 16, %s386_s7, [#allocation42]  }
 0x216   :  { %4575 = dma.done.wait [#allocation3], 256  }
 0x217   :  { %4576 = vsyncadd [#allocation3], 4294967040 }
 0x218   :  { %4577 = dma.done.wait [#allocation6], 1040  }
 0x219   :  { %4578 = vsyncadd [#allocation6], 4294966256 }
 0x21a   :  { %4579 = dma.done.wait [#allocation9], 1040  }
 0x21b   :  { %4580 = vsyncadd [#allocation9], 4294966256 }
 0x21c   :  { %4581 = dma.done.wait [#allocation12], 1040  }
 0x21d   :  { %4582 = vsyncadd [#allocation12], 4294966256 }
 0x21e   :  { %4583 = dma.done.wait [#allocation15], 1040  }
 0x21f   :  { %4584 = vsyncadd [#allocation15], 4294966256 }
 0x220   :  { %4585 = dma.done.wait [#allocation18], 1040  }
 0x221   :  { %4586 = vsyncadd [#allocation18], 4294966256 }
 0x222   :  { %4587 = dma.done.wait [#allocation21], 1040  }
 0x223   :  { %4588 = vsyncadd [#allocation21], 4294966256 }
 0x224   :  { %4589 = dma.done.wait [#allocation24], 4096  }
 0x225   :  { %4590 = vsyncadd [#allocation24], 4294963200 }
 0x226   :  { %4591 = dma.done.wait [#allocation27], 1040  }
 0x227   :  { %4592 = vsyncadd [#allocation27], 4294966256 }
 0x228   :  { %4593 = dma.done.wait [#allocation30], 1040  }
 0x229   :  { %4594 = vsyncadd [#allocation30], 4294966256 }
 0x22a   :  { %4595 = dma.done.wait [#allocation33], 1040  }
 0x22b   :  { %4596 = vsyncadd [#allocation33], 4294966256 }
 0x22c   :  { %4597 = dma.done.wait [#allocation36], 1040  }
 0x22d   :  { %4598 = vsyncadd [#allocation36], 4294966256 }
 0x22e   :  { %4599 = dma.done.wait [#allocation39], 1040  }
 0x22f   :  { %4600 = vsyncadd [#allocation39], 4294966256 }
 0x230   :  { %4601 = dma.done.wait [#allocation42], 16  }
 0x231   :  { %4602 = vsyncadd [#allocation42], 4294967280  ;;  %s5371_s25 = sld [smem:[#allocation63_spill]]  ;;  %v4670_v0 = vmov 0   ;;  %s5372_s30 = sld [smem:[#allocation60_spill]]  ;;  %v4671_v23 = vmov 0.0   ;;  %v478_v59 = vlaneseq }
 0x232   :  { %821 = vmatprep.mubr.bf16.mxu0 %v4670_v0  ;;  %3818 = vset.pattern.permute.xlu1 %v4670_v0  ;;  %s5373_s15 = sld [smem:[#allocation59_spill]]  ;;  %v468_v37 = vld [vmem:[#allocation2] sm:$0xff]  ;;  %v469_v38 = vld [vmem:[#allocation2 + $0x8] sm:$0xff]  ;;  %vm4672_vm0 = vmmov 0   ;;  %v3851_v53 = vld [vmem:[#allocation5] sm:$0xff]   ;;  %s5374_s16 = sld [smem:[#allocation64_spill]] }
 0x233   :  { %3817 = vset.pattern.permute.xlu0 %v4670_v0  ;;  %3403 = vmatprep.subr.bf16.mxu1 %v4671_v23  ;;  %v611_v40 = vpack.c.bf16 %v469_v38, %v468_v37  ;;  %v3852_v54 = vld [vmem:[#allocation5 + $0x8] sm:$0xff]   ;;  %v3853_v55 = vld [vmem:[#allocation5 + $0x10] sm:$0xff]   ;;  %v3854_v56 = vld [vmem:[#allocation5 + $0x18] sm:$0xff]   ;;  %v5047_v62 = vshrl.u32 %v478_v59, 7  ;;  %vm876_vm11 = vcmask 261120   ;;  %s5375_s18 = sld [smem:[#allocation62_spill]] }
 0x234   :  { %3419 = vmatprep.mubr.msk.bf16.mxu1 %vm4672_vm0, %v4671_v23  ;;  %s5376_s24 = sld [smem:[#allocation61_spill]]  ;;  %s4674_s22 = smov [#allocation43]  }
 0x235   :  { %s5377_s27 = sld [smem:[#allocation69_spill]]  ;;  %s3014_s12 = sshll.u32 %s4674_s22, 4  ;;  %s3015_s12 = int_to_ptr.vmem [resolvable:$true] %s3014_s12 }
 0x236   :  { %s4553_s23 = scalar_lea.vmem %s3015_s12, 256  ;;  %p4558_p13 = scmp.lt.s32.totalorder %s3015_s12, %s3015_s12 }
 0x237   :  { %v3819_v1 = vld [vmem:[%s5371_s25 + $0x4] ss:$12 sps:$4 sm:$0xff]   ;;  %v3821_v2 = vld [vmem:[%s5371_s25] ss:$12 sps:$4 sm:$0xff]   ;;  %v3822_v3 = vld [vmem:[%s5371_s25 + $0x1c] ss:$12 sps:$4 sm:$0xff]   ;;  %p4554_p12 = scmp.ne.s32.totalorder %s3015_s12, %s4553_s23  ;;  %p4559_p0 = scmp.lt.s32.totalorder %s4553_s23, %s4553_s23 }
 0x238   :  { %789 = vmatprep.subr.bf16.mxu0 %v3819_v1  ;;  %v3824_v4 = vld [vmem:[%s5371_s25 + $0x18] ss:$12 sps:$4 sm:$0xff]   ;;  %v3825_v5 = vld [vmem:[%s5371_s25 + $0x34] ss:$12 sps:$4 sm:$0xff]   ;;  %v3827_v6 = vld [vmem:[%s5371_s25 + $0x30] ss:$12 sps:$4 sm:$0xff]  }
 0x239   :  { %790 = vmatpush1.bf16.msra.mxu0 %v3821_v2  ;;  %v3828_v7 = vld [vmem:[%s5371_s25 + $0x4c] ss:$12 sps:$4 sm:$0xff]   ;;  %v3830_v8 = vld [vmem:[%s5371_s25 + $0x48] ss:$12 sps:$4 sm:$0xff]   ;;  %v520_v9 = vld [vmem:[%s5372_s30] sm:$0xff]  ;;  %v648_v2 = vsub.s32 0, %v5047_v62  ;;  %p4560_p1 = por %p4559_p0, %p4558_p13 }
 0x23a   :  { %791 = vmatprep.subr.bf16.mxu0 %v3822_v3  ;;  %v480_v10 = vld [vmem:[%s5373_s15] sm:$0xff]  ;;  %v528_v12 = vadd.s32 16, %v520_v9  ;;  %v521_v13 = vld [vmem:[%s5372_s30 + $0x8] sm:$0xff]  ;;  %v523_v15 = vld [vmem:[%s5372_s30 + $0x18] sm:$0xff] }
 0x23b   :  { %v3831_v11 = vld [vmem:[%s5371_s25 + $0x64] ss:$12 sps:$4 sm:$0xff]   ;;  %489 = vperm.xlu0 %3817, %v480_v10   ;;  %v481_v14 = vld [vmem:[%s5373_s15 + $0x8] sm:$0xff]  ;;  %v529_v18 = vadd.s32 16, %v521_v13  ;;  %v531_v24 = vadd.s32 16, %v523_v15  ;;  %v483_v29 = vld [vmem:[%s5373_s15 + $0x18] sm:$0xff]  ;;  %p4561_p2 = pnand %p4560_p1, %p4554_p12 }
 0x23c   :  { %v522_v16 = vld [vmem:[%s5372_s30 + $0x10] sm:$0xff]  ;;  %v3833_v17 = vld [vmem:[%s5371_s25 + $0x60] ss:$12 sps:$4 sm:$0xff]   ;;  %537 = vperm.xlu1 %3818, %v528_v12   ;;  %v3834_v20 = vld [vmem:[%s5371_s25 + $0x7c] ss:$12 sps:$4 sm:$0xff]  }
 0x23d   :  { %792 = vmatpush1.bf16.msra.mxu0 %v3824_v4  ;;  %v525_v19 = vld [vmem:[%s5372_s30 + $0x28] sm:$0xff]  ;;  %v482_v21 = vld [vmem:[%s5373_s15 + $0x10] sm:$0xff]  ;;  %v524_v22 = vld [vmem:[%s5372_s30 + $0x20] sm:$0xff]  ;;  %v530_v25 = vadd.s32 16, %v522_v16  ;;  %v652_v4 = vsub.s32 1, %v5047_v62 }
 0x23e   :  { %793 = vmatprep.subr.bf16.mxu0 %v3825_v5  ;;  %v533_v26 = vadd.s32 16, %v525_v19  ;;  %v526_v27 = vld [vmem:[%s5372_s30 + $0x30] sm:$0xff]  ;;  %v3836_v28 = vld [vmem:[%s5371_s25 + $0x78] ss:$12 sps:$4 sm:$0xff]   ;;  %v532_v30 = vadd.s32 16, %v524_v22  ;;  %v485_v39 = vld [vmem:[%s5373_s15 + $0x28] sm:$0xff] }
 0x23f   :  { %492 = vperm.xlu0 %3817, %v481_v14   ;;  %v534_v31 = vadd.s32 16, %v526_v27  ;;  %v3837_v32 = vld [vmem:[%s5371_s25 + $0x94] ss:$12 sps:$4 sm:$0xff]   ;;  %v3839_v33 = vld [vmem:[%s5371_s25 + $0x90] ss:$12 sps:$4 sm:$0xff]   ;;  %v5054_v5 = vand.u32 127, %v478_v59 }
 0x240   :  { %540 = vperm.xlu1 %3818, %v529_v18   ;;  %v3840_v34 = vld [vmem:[%s5371_s25 + $0xac] ss:$12 sps:$4 sm:$0xff]   ;;  %v484_v35 = vld [vmem:[%s5373_s15 + $0x20] sm:$0xff]  ;;  %v3842_v36 = vld [vmem:[%s5371_s25 + $0xa8] ss:$12 sps:$4 sm:$0xff]   ;;  %v4673_v22 = vmov 0.0|0.0  }
 0x241   :  { %794 = vmatpush1.bf16.msra.mxu0 %v3827_v6  ;;  %v486_v41 = vld [vmem:[%s5373_s15 + $0x30] sm:$0xff]  ;;  %v487_v42 = vld [vmem:[%s5373_s15 + $0x38] sm:$0xff]  ;;  %v3844_v46 = vld [vmem:[%s5371_s25 + $0x20] ss:$12 sps:$4 sm:$0xff]  }
 0x242   :  { %795 = vmatprep.subr.bf16.mxu0 %v3828_v7  ;;  %v527_v43 = vld [vmem:[%s5372_s30 + $0x38] sm:$0xff]  ;;  %v3843_v45 = vld [vmem:[%s5371_s25 + $0x8] ss:$12 sps:$4 sm:$0xff]   ;;  %v3848_v50 = vld [vmem:[%s5371_s25 + $0x80] ss:$12 sps:$4 sm:$0xff]  }
 0x243   :  { %495 = vperm.xlu0 %3817, %v482_v21   ;;  %v535_v44 = vadd.s32 16, %v527_v43  ;;  %3404 = vmatpush3.bf16.msra.mxu1 %v3843_v45  ;;  %v3845_v47 = vld [vmem:[%s5371_s25 + $0x38] ss:$12 sps:$4 sm:$0xff]   ;;  %v3846_v48 = vld [vmem:[%s5371_s25 + $0x50] ss:$12 sps:$4 sm:$0xff]   ;;  %v3858_v45 = vld [vmem:[#allocation5 + $0x38] sm:$0xff]  }
 0x244   :  { %498 = vperm.xlu1 %3818, %v483_v29   ;;  %3405 = vmatprep.subr.bf16.mxu1 %v4671_v23  ;;  %v3847_v49 = vld [vmem:[%s5371_s25 + $0x68] ss:$12 sps:$4 sm:$0xff]   ;;  %v3849_v51 = vld [vmem:[%s5371_s25 + $0x98] ss:$12 sps:$4 sm:$0xff]   ;;  %v3850_v52 = vld [vmem:[%s5371_s25 + $0xb0] ss:$12 sps:$4 sm:$0xff]  }
 0x245   :  { %796 = vmatpush1.bf16.msra.mxu0 %v3830_v8  ;;  %v5051_v3 = vld [vmem:[%s5374_s16] sm:$0x7]  ;;  %v3856_v43 = vld [vmem:[#allocation5 + $0x28] sm:$0xff]  }
 0x246   :  { %797 = vmatprep.subr.bf16.mxu0 %v3831_v11  ;;  %v649_v7 = vrot.slane %v5051_v3, %v648_v2  ;;  %v653_v10 = vrot.slane %v5051_v3, %v652_v4 }
 0x247   :  { %543 = vperm.xlu0 %3817, %v530_v25   ;;  %3406 = vmatpush3.bf16.msra.mxu1 %v3844_v46  ;;  %v3859_v46 = vld [vmem:[#allocation8] sm:$0xff]  }
 0x248   :  { %546 = vperm.xlu1 %3818, %v531_v24   ;;  %3407 = vmatprep.subr.bf16.mxu1 %v4671_v23 }
 0x249   :  { %798 = vmatpush1.bf16.msra.mxu0 %v3833_v17 }
 0x24a   :  { %799 = vmatprep.subr.bf16.mxu0 %v3834_v20 }
 0x24b   :  { %501 = vperm.xlu0 %3817, %v484_v35   ;;  %3408 = vmatpush3.bf16.msra.mxu1 %v3845_v47  ;;  %v3860_v47 = vld [vmem:[#allocation8 + $0x8] sm:$0xff]  }
 0x24c   :  { %504 = vperm.xlu1 %3818, %v485_v39   ;;  %3409 = vmatprep.subr.bf16.mxu1 %v4671_v23 }
 0x24d   :  { %800 = vmatpush1.bf16.msra.mxu0 %v3836_v28 }
 0x24e   :  { %801 = vmatprep.subr.bf16.mxu0 %v3837_v32 }
 0x24f   :  { %549 = vperm.xlu0 %3817, %v532_v30   ;;  %3410 = vmatpush3.bf16.msra.mxu1 %v3846_v48  ;;  %v3861_v48 = vld [vmem:[#allocation8 + $0x10] sm:$0xff]  }
 0x250   :  { %552 = vperm.xlu1 %3818, %v533_v26   ;;  %3411 = vmatprep.subr.bf16.mxu1 %v4671_v23 }
 0x251   :  { %802 = vmatpush1.bf16.msra.mxu0 %v3839_v33 }
 0x252   :  { %803 = vmatprep.subr.bf16.mxu0 %v3840_v34 }
 0x253   :  { %507 = vperm.xlu0 %3817, %v486_v41   ;;  %3412 = vmatpush3.bf16.msra.mxu1 %v3847_v49  ;;  %v3862_v49 = vld [vmem:[#allocation8 + $0x18] sm:$0xff]  }
 0x254   :  { %510 = vperm.xlu1 %3818, %v487_v42   ;;  %3413 = vmatprep.subr.bf16.mxu1 %v4671_v23  ;;  %v3855_v42 = vld [vmem:[#allocation5 + $0x20] sm:$0xff]  }
 0x255   :  { %804 = vmatpush1.bf16.msra.mxu0 %v3842_v36 }
 0x256   :  { %889 = vmatprep.subr.bf16.mxu0 %v611_v40 }
 0x257   :  { %555 = vperm.xlu0 %3817, %v534_v31   ;;  %3414 = vmatpush3.bf16.msra.mxu1 %v3848_v50  ;;  %v3863_v50 = vld [vmem:[#allocation8 + $0x20] sm:$0xff]  }
 0x258   :  { %822 = vmatmul.mubr.bf16.vlgmr.msra.gmra.mrb[0].mxu0 %v611_v40  ;;  %558 = vperm.xlu1 %3818, %v535_v44   ;;  %v3857_v44 = vld [vmem:[#allocation5 + $0x30] sm:$0xff]  }
 0x259   :  { %921 = vmatprep.mubr.bf16.mxu0 %v4670_v0  ;;  %3415 = vmatprep.subr.bf16.mxu1 %v4671_v23 }
 0x25b   :  { %3416 = vmatpush3.bf16.msra.mxu1 %v3849_v51  ;;  %v3864_v51 = vld [vmem:[#allocation8 + $0x28] sm:$0xff]  }
 0x25c   :  { %3417 = vmatprep.subr.bf16.mxu1 %v4671_v23 }
 0x25f   :  { %3418 = vmatpush3.bf16.msra.mxu1 %v3850_v52  ;;  %v5107_v52 = vld [vmem:[%s5375_s18] sm:$0xff] }
 0x260   :  { %3423 = vmatprep.subr.bf16.mxu1 %v3851_v53 }
 0x262   :  { %3420 = vmatmul.mubr.bf16.vlgmr.msra.gmra.mrb[0].mxu1 %v611_v40 }
 0x263   :  { %3424 = vmatpush3.bf16.msra.mxu1 %v3851_v53 }
 0x264   :  { %3425 = vmatprep.subr.bf16.mxu1 %v3852_v54 }
 0x267   :  { %3426 = vmatpush3.bf16.msra.mxu1 %v3852_v54  ;;  %v5110_v54 = vld [vmem:[%s5375_s18 + $0x8] sm:$0xff] }
 0x268   :  { %3427 = vmatprep.subr.bf16.mxu1 %v3853_v55 }
 0x26b   :  { %3428 = vmatpush3.bf16.msra.mxu1 %v3853_v55 }
 0x26c   :  { %3429 = vmatprep.subr.bf16.mxu1 %v3854_v56 }
 0x26f   :  { %3430 = vmatpush3.bf16.msra.mxu1 %v3854_v56 }
 0x270   :  { %3431 = vmatprep.subr.bf16.mxu1 %v3855_v42 }
 0x273   :  { %3432 = vmatpush3.bf16.msra.mxu1 %v3855_v42 }
 0x274   :  { %3433 = vmatprep.subr.bf16.mxu1 %v3856_v43 }
 0x277   :  { %3434 = vmatpush3.bf16.msra.mxu1 %v3856_v43  ;;  %v3865_v43 = vld [vmem:[#allocation8 + $0x30] sm:$0xff]  }
 0x278   :  { %3435 = vmatprep.subr.bf16.mxu1 %v3857_v44 }
 0x27b   :  { %3436 = vmatpush3.bf16.msra.mxu1 %v3857_v44  ;;  %v3866_v44 = vld [vmem:[#allocation8 + $0x38] sm:$0xff]  }
 0x27c   :  { %3437 = vmatprep.subr.bf16.mxu1 %v3858_v45 }
 0x27f   :  { %3438 = vmatpush3.bf16.msra.mxu1 %v3858_v45  ;;  %v3867_v45 = vld [vmem:[#allocation11] sm:$0xff]  }
 0x280   :  { %3471 = vmatprep.subr.bf16.mxu1 %v3867_v45 }
 0x2ba   :  { %v490_v57 = vpop.permute.xlu0 %489 }
 0x2bb   :  { %v538_v58 = vpop.permute.xlu1 %537  ;;  %vm512_vm2 = vcmp.eq.s32.totalorder %v490_v57, %v5054_v5 }
 0x2bc   :  { %vm560_vm1 = vcmp.eq.s32.totalorder %v538_v58, %v5054_v5 }
 0x2bd   :  { %vm568_vm5 = vmor %vm512_vm2, %vm560_vm1 }
 0x2be   :  { %v493_v60 = vpop.permute.xlu0 %492  ;;  %v3072_v24 = vsel %vm568_vm5, 1.0, %v4671_v23 }
 0x2bf   :  { %v541_v61 = vpop.permute.xlu1 %540  ;;  %vm513_vm4 = vcmp.eq.s32.totalorder %v493_v60, %v5054_v5 }
 0x2c0   :  { %vm561_vm3 = vcmp.eq.s32.totalorder %v541_v61, %v5054_v5 }
 0x2c1   :  { %vm569_vm6 = vmor %vm513_vm4, %vm561_vm3 }
 0x2c2   :  { %v496_v63 = vpop.permute.xlu0 %495  ;;  %v3073_v25 = vsel %vm569_vm6, 1.0, %v4671_v23 }
 0x2c3   :  { %v499_v1 = vpop.permute.xlu1 %498  ;;  %vm514_vm7 = vcmp.eq.s32.totalorder %v496_v63, %v5054_v5  ;;  %v5073_v27 = vpack.c.bf16 %v3073_v25, %v3072_v24  ;;  %v5119_v63 = vld [vmem:[%s5375_s18 + $0x10] sm:$0xff] }
 0x2c4   :  { %vm515_vm9 = vcmp.eq.s32.totalorder %v499_v1, %v5054_v5 }
 0x2c6   :  { %v544_v6 = vpop.permute.xlu0 %543 }
 0x2c7   :  { %v547_v8 = vpop.permute.xlu1 %546  ;;  %vm562_vm8 = vcmp.eq.s32.totalorder %v544_v6, %v5054_v5  ;;  %v5122_v6 = vld [vmem:[%s5375_s18 + $0x18] sm:$0xff] }
 0x2c8   :  { %vm563_vm10 = vcmp.eq.s32.totalorder %v547_v8, %v5054_v5  ;;  %vm570_vm12 = vmor %vm514_vm7, %vm562_vm8 }
 0x2c9   :  { %vm571_vm13 = vmor %vm515_vm9, %vm563_vm10  ;;  %v3074_v30 = vsel %vm570_vm12, 1.0, %v4671_v23 }
 0x2ca   :  { %v502_v18 = vpop.permute.xlu0 %501  ;;  %v3075_v29 = vsel %vm571_vm13, 1.0, %v4671_v23 }
 0x2cb   :  { %v505_v20 = vpop.permute.xlu1 %504  ;;  %vm516_vm14 = vcmp.eq.s32.totalorder %v502_v18, %v5054_v5  ;;  %v5084_v33 = vpack.c.bf16 %v3075_v29, %v3074_v30 }
 0x2cc   :  { %vm517_vm1 = vcmp.eq.s32.totalorder %v505_v20, %v5054_v5 }
 0x2ce   :  { %v550_v26 = vpop.permute.xlu0 %549 }
 0x2cf   :  { %v553_v28 = vpop.permute.xlu1 %552  ;;  %vm564_vm15 = vcmp.eq.s32.totalorder %v550_v26, %v5054_v5 }
 0x2d0   :  { %vm565_vm2 = vcmp.eq.s32.totalorder %v553_v28, %v5054_v5  ;;  %vm572_vm3 = vmor %vm516_vm14, %vm564_vm15  ;;  %v5143_v28 = vld [vmem:[%s5375_s18 + $0x30] sm:$0xff]  ;;  %vm1426_vm14 = vcmask 523264  }
 0x2d1   :  { %vm573_vm4 = vmor %vm517_vm1, %vm565_vm2  ;;  %v3076_v37 = vsel %vm572_vm3, 1.0, %v4671_v23 }
 0x2d2   :  { %v508_v31 = vpop.permute.xlu0 %507  ;;  %v3077_v36 = vsel %vm573_vm4, 1.0, %v4671_v23 }
 0x2d3   :  { %v511_v32 = vpop.permute.xlu1 %510  ;;  %vm518_vm5 = vcmp.eq.s32.totalorder %v508_v31, %v5054_v5  ;;  %v5095_v38 = vpack.c.bf16 %v3077_v36, %v3076_v37  ;;  %v5146_v31 = vld [vmem:[%s5375_s18 + $0x38] sm:$0xff] }
 0x2d4   :  { %vm519_vm7 = vcmp.eq.s32.totalorder %v511_v32, %v5054_v5 }
 0x2d6   :  { %v556_v34 = vpop.permute.xlu0 %555 }
 0x2d7   :  { %v559_v35 = vpop.permute.xlu1 %558  ;;  %vm566_vm6 = vcmp.eq.s32.totalorder %v556_v34, %v5054_v5 }
 0x2d8   :  { %vm567_vm8 = vcmp.eq.s32.totalorder %v559_v35, %v5054_v5  ;;  %vm574_vm9 = vmor %vm518_vm5, %vm566_vm6 }
 0x2d9   :  { %vm575_vm10 = vmor %vm519_vm7, %vm567_vm8  ;;  %v3078_v40 = vsel %vm574_vm9, 1.0, %v4671_v23 }
 0x2da   :  { %v3079_v39 = vsel %vm575_vm10, 1.0, %v4671_v23 }
 0x2db   :  { %v5102_v41 = vpack.c.bf16 %v3079_v39, %v3078_v40 }
 0x32b   :  { %v823_v9 = vpop.f32.mrb[0].mxu0 }
 0x32c   :  { %v825_v11 = vpop.f32.mrb[1].mxu0  ;;  %v824_v13 = vadd.f32 %v823_v9, %v649_v7 }
 0x32d   :  { %v827_v12 = vpop.f32.mrb[2].mxu0  ;;  %v826_v16 = vadd.f32 %v825_v11, %v653_v10 }
 0x32e   :  { %v828_v14 = vadd.f32 %v827_v12, %v649_v7  ;;  %v829_v15 = vpop.f32.mrb[3].mxu0 }
 0x32f   :  { %v830_v17 = vadd.f32 %v829_v15, %v653_v10 }
 0x330   :  { %v873_v19 = vpack.c.bf16 %v828_v14, %v824_v13  ;;  %v5131_v14 = vld [vmem:[%s5375_s18 + $0x20] sm:$0xff] }
 0x331   :  { %v874_v21 = vpack.c.bf16 %v830_v17, %v826_v16  ;;  %v5134_v17 = vld [vmem:[%s5375_s18 + $0x28] sm:$0xff] }
 0x332   :  { %890 = vmatpush1.bf16.msra.mxu0 %v873_v19 }
 0x333   :  { %891 = vmatprep.subr.bf16.mxu0 %v4673_v22 }
 0x336   :  { %892 = vmatpush1.bf16.msra.mxu0 %v874_v21 }
 0x337   :  { %3447 = vmatprep.subr.bf16.mxu0 %v3859_v46 }
 0x339   :  { %3107 = vmatmul.mubr.msk.bf16.vlgmr.msra.gmra.mrb[4].mxu0 %vm876_vm11, %v5073_v27 }
 0x33a   :  { %931 = vmatprep.mubr.bf16.mxu0 %v4670_v0  ;;  %3448 = vmatpush3.bf16.msra.mxu0 %v3859_v46  ;;  %v3868_v46 = vld [vmem:[#allocation11 + $0x8] sm:$0xff]  }
 0x33b   :  { %3449 = vmatprep.subr.bf16.mxu0 %v3860_v47 }
 0x33e   :  { %3450 = vmatpush3.bf16.msra.mxu0 %v3860_v47  ;;  %v3869_v47 = vld [vmem:[#allocation11 + $0x10] sm:$0xff]  }
 0x33f   :  { %3451 = vmatprep.subr.bf16.mxu0 %v3861_v48 }
 0x341   :  { %3108 = vmatmul.mubr.msk.bf16.gmra.mrb[8].mxu0 %vm876_vm11, %v5084_v33 }
 0x342   :  { %941 = vmatprep.mubr.bf16.mxu0 %v4670_v0  ;;  %3452 = vmatpush3.bf16.msra.mxu0 %v3861_v48  ;;  %v3870_v48 = vld [vmem:[#allocation11 + $0x18] sm:$0xff]  }
 0x343   :  { %3453 = vmatprep.subr.bf16.mxu0 %v3862_v49 }
 0x346   :  { %3454 = vmatpush3.bf16.msra.mxu0 %v3862_v49  ;;  %v3871_v49 = vld [vmem:[#allocation11 + $0x20] sm:$0xff]  }
 0x347   :  { %3455 = vmatprep.subr.bf16.mxu0 %v3863_v50 }
 0x349   :  { %3109 = vmatmul.mubr.msk.bf16.gmra.mrb[12].mxu0 %vm876_vm11, %v5095_v38 }
 0x34a   :  { %951 = vmatprep.mubr.bf16.mxu0 %v4670_v0  ;;  %3456 = vmatpush3.bf16.msra.mxu0 %v3863_v50  ;;  %v3872_v50 = vld [vmem:[#allocation11 + $0x28] sm:$0xff]  }
 0x34b   :  { %3457 = vmatprep.subr.bf16.mxu0 %v3864_v51 }
 0x34e   :  { %3458 = vmatpush3.bf16.msra.mxu0 %v3864_v51  ;;  %v3111_v51 = vld [vmem:[#allocation7] ss:$0 sm:$0xff] }
 0x34f   :  { %3459 = vmatprep.subr.bf16.mxu0 %v3865_v43 }
 0x351   :  { %3110 = vmatmul.mubr.msk.bf16.gmra.mrb[16].mxu0 %vm876_vm11, %v5102_v41 }
 0x352   :  { %3460 = vmatpush3.bf16.msra.mxu0 %v3865_v43  ;;  %v3873_v43 = vld [vmem:[#allocation11 + $0x30] sm:$0xff]  }
 0x353   :  { %3461 = vmatprep.subr.bf16.mxu0 %v3866_v44 }
 0x356   :  { %3462 = vmatpush3.bf16.msra.mxu0 %v3866_v44  ;;  %v3874_v44 = vld [vmem:[#allocation11 + $0x38] sm:$0xff]  }
 0x357   :  { %3527 = vmatprep.subr.bf16.mxu0 %v4671_v23 }
 0x40c   :  { %v923_v53 = vpop.f32.mrb[4].mxu0 }
 0x40d   :  { %v962_v55 = vadd.f32 %v923_v53, %v5107_v52  ;;  %v5113_v56 = vpop.f32.mrb[5].mxu0 }
 0x40e   :  { %v927_v57 = vpop.f32.mrb[6].mxu0 }
 0x40f   :  { %v963_v58 = vadd.f32 %v927_v57, %v5110_v54  ;;  %v5116_v59 = vpop.f32.mrb[7].mxu0  ;;  %v970_v60 = vmax.f32 %v962_v55, 0.0 }
 0x411   :  { %v971_v61 = vmax.f32 %v963_v58, 0.0 }
 0x413   :  { %v978_v1 = vpack.c.bf16 %v971_v61, %v970_v60 }
 0x414   :  { %v933_v5 = vpop.f32.mrb[8].mxu0 }
 0x415   :  { %v964_v7 = vadd.f32 %v933_v5, %v5119_v63  ;;  %v5125_v8 = vpop.f32.mrb[9].mxu0  ;;  %3439 = vmatprep.mubr.bf16.mxu1 %v978_v1 }
 0x416   :  { %v937_v9 = vpop.f32.mrb[10].mxu0 }
 0x417   :  { %v965_v10 = vadd.f32 %v937_v9, %v5122_v6  ;;  %v5128_v11 = vpop.f32.mrb[11].mxu0  ;;  %v972_v12 = vmax.f32 %v964_v7, 0.0 }
 0x419   :  { %v973_v13 = vmax.f32 %v965_v10, 0.0 }
 0x41b   :  { %v979_v15 = vpack.c.bf16 %v973_v13, %v972_v12 }
 0x41c   :  { %v943_v16 = vpop.f32.mrb[12].mxu0 }
 0x41d   :  { %v966_v18 = vadd.f32 %v943_v16, %v5131_v14  ;;  %v5137_v19 = vpop.f32.mrb[13].mxu0  ;;  %3440 = vmatmul.mubr.bf16.vlgmr.msra.gmra.mrb[4].mxu1 %v979_v15 }
 0x41e   :  { %v947_v20 = vpop.f32.mrb[14].mxu0  ;;  %3472 = vmatpush3.bf16.msra.mxu1 %v3867_v45  ;;  %v3120_v45 = vld [vmem:[#allocation10] ss:$0 sm:$0xff] }
 0x41f   :  { %v967_v21 = vadd.f32 %v947_v20, %v5134_v17  ;;  %v5140_v24 = vpop.f32.mrb[15].mxu0  ;;  %v974_v25 = vmax.f32 %v966_v18, 0.0  ;;  %3473 = vmatprep.subr.bf16.mxu1 %v3868_v46 }
 0x421   :  { %v975_v26 = vmax.f32 %v967_v21, 0.0 }
 0x422   :  { %3474 = vmatpush3.bf16.msra.mxu1 %v3868_v46 }
 0x423   :  { %v980_v29 = vpack.c.bf16 %v975_v26, %v974_v25  ;;  %3475 = vmatprep.subr.bf16.mxu1 %v3869_v47 }
 0x424   :  { %v953_v30 = vpop.f32.mrb[16].mxu0 }
 0x425   :  { %v968_v32 = vadd.f32 %v953_v30, %v5143_v28  ;;  %v5149_v34 = vpop.f32.mrb[17].mxu0  ;;  %3443 = vmatprep.mubr.bf16.mxu1 %v980_v29 }
 0x426   :  { %v957_v35 = vpop.f32.mrb[18].mxu0  ;;  %3476 = vmatpush3.bf16.msra.mxu1 %v3869_v47 }
 0x427   :  { %v969_v36 = vadd.f32 %v957_v35, %v5146_v31  ;;  %v5152_v37 = vpop.f32.mrb[19].mxu0  ;;  %v976_v39 = vmax.f32 %v968_v32, 0.0  ;;  %3477 = vmatprep.subr.bf16.mxu1 %v3870_v48 }
 0x429   :  { %v977_v40 = vmax.f32 %v969_v36, 0.0 }
 0x42a   :  { %3478 = vmatpush3.bf16.msra.mxu1 %v3870_v48 }
 0x42b   :  { %v981_v42 = vpack.c.bf16 %v977_v40, %v976_v39  ;;  %3479 = vmatprep.subr.bf16.mxu1 %v3871_v49 }
 0x42d   :  { %3444 = vmatmul.mubr.bf16.gmra.mrb[8].mxu1 %v981_v42 }
 0x42e   :  { %3480 = vmatpush3.bf16.msra.mxu1 %v3871_v49 }
 0x42f   :  { %3481 = vmatprep.subr.bf16.mxu1 %v3872_v50 }
 0x432   :  { %3482 = vmatpush3.bf16.msra.mxu1 %v3872_v50 }
 0x433   :  { %3483 = vmatprep.subr.bf16.mxu1 %v3873_v43 }
 0x436   :  { %3484 = vmatpush3.bf16.msra.mxu1 %v3873_v43 }
 0x437   :  { %3485 = vmatprep.subr.bf16.mxu1 %v3874_v44 }
 0x43a   :  { %3486 = vmatpush3.bf16.msra.mxu1 %v3874_v44 }
 0x43b   :  { %3495 = vmatprep.subr.bf16.mxu1 %v4671_v23 }
 0x4f0   :  { %v3441_v53 = vpop.f32.mrb[4].mxu1 }
 0x4f1   :  { %v1096_v55 = vadd.f32 %v3441_v53, %v3111_v51  ;;  %v1087_v57 = vpop.f32.mrb[5].mxu1 }
 0x4f2   :  { %v1088_v58 = vadd.f32 %v3111_v51, %v1087_v57  ;;  %v3442_v60 = vpop.f32.mrb[6].mxu1 }
 0x4f3   :  { %v1099_v61 = vadd.f32 %v3442_v60, %v3111_v51  ;;  %v1090_v1 = vpop.f32.mrb[7].mxu1  ;;  %v1120_v7 = vmax.f32 %v1096_v55, 0.0 }
 0x4f4   :  { %v1091_v5 = vadd.f32 %v3111_v51, %v1090_v1  ;;  %v1118_v10 = vmax.f32 %v1088_v58, 0.0 }
 0x4f5   :  { %v1121_v9 = vmax.f32 %v1099_v61, 0.0 }
 0x4f6   :  { %v1119_v12 = vmax.f32 %v1091_v5, 0.0 }
 0x4f7   :  { %v1127_v13 = vpack.c.bf16 %v1121_v9, %v1120_v7 }
 0x4f8   :  { %v1126_v15 = vpack.c.bf16 %v1119_v12, %v1118_v10 }
 0x4fa   :  { %3463 = vmatprep.mubr.bf16.mxu0 %v1126_v15 }
 0x4fb   :  { %3464 = vmatmul.mubr.bf16.vlgmr.msra.gmra.mrb[20].mxu0 %v1127_v13 }
 0x500   :  { %v3445_v16 = vpop.f32.mrb[8].mxu1 }
 0x501   :  { %v1112_v18 = vadd.f32 %v3445_v16, %v3111_v51  ;;  %v1103_v20 = vpop.f32.mrb[9].mxu1 }
 0x502   :  { %v1104_v21 = vadd.f32 %v3111_v51, %v1103_v20  ;;  %v3446_v25 = vpop.f32.mrb[10].mxu1 }
 0x503   :  { %v1115_v26 = vadd.f32 %v3446_v25, %v3111_v51  ;;  %v1106_v29 = vpop.f32.mrb[11].mxu1  ;;  %v1124_v32 = vmax.f32 %v1112_v18, 0.0 }
 0x504   :  { %v1107_v30 = vadd.f32 %v3111_v51, %v1106_v29  ;;  %v1122_v36 = vmax.f32 %v1104_v21, 0.0 }
 0x505   :  { %v1125_v35 = vmax.f32 %v1115_v26, 0.0 }
 0x506   :  { %v1123_v39 = vmax.f32 %v1107_v30, 0.0 }
 0x507   :  { %v1129_v40 = vpack.c.bf16 %v1125_v35, %v1124_v32  ;;  %v3129_v32 = vld [vmem:[#allocation13] ss:$0 sm:$0xff] }
 0x508   :  { %v1128_v42 = vpack.c.bf16 %v1123_v39, %v1122_v36 }
 0x50a   :  { %3467 = vmatprep.mubr.bf16.mxu0 %v1128_v42 }
 0x50b   :  { %3468 = vmatmul.mubr.bf16.gmra.mrb[24].mxu0 %v1129_v40 }
 0x50c   :  { %3543 = vmatprep.mubr.msk.bf16.mxu0 %vm4672_vm0, %v4671_v23 }
 0x5ce   :  { %v3465_v46 = vpop.f32.mrb[20].mxu0 }
 0x5cf   :  { %v1244_v47 = vadd.f32 %v3465_v46, %v3120_v45  ;;  %v1235_v48 = vpop.f32.mrb[21].mxu0 }
 0x5d0   :  { %v1236_v49 = vadd.f32 %v3120_v45, %v1235_v48  ;;  %v3466_v50 = vpop.f32.mrb[22].mxu0 }
 0x5d1   :  { %v1247_v51 = vadd.f32 %v3466_v50, %v3120_v45  ;;  %v1238_v53 = vpop.f32.mrb[23].mxu0  ;;  %v1268_v57 = vmax.f32 %v1244_v47, 0.0 }
 0x5d2   :  { %v1239_v55 = vadd.f32 %v3120_v45, %v1238_v53  ;;  %v1266_v60 = vmax.f32 %v1236_v49, 0.0 }
 0x5d3   :  { %v1269_v58 = vmax.f32 %v1247_v51, 0.0 }
 0x5d4   :  { %v1267_v61 = vmax.f32 %v1239_v55, 0.0 }
 0x5d5   :  { %v1275_v1 = vpack.c.bf16 %v1269_v58, %v1268_v57 }
 0x5d6   :  { %v1274_v5 = vpack.c.bf16 %v1267_v61, %v1266_v60 }
 0x5d8   :  { %3487 = vmatprep.mubr.bf16.mxu1 %v1274_v5  ;;  %v3080_v5 = vld [vmem:[%s5376_s24] ss:$0 sm:$0xff] }
 0x5d9   :  { %3488 = vmatmul.mubr.bf16.vlgmr.msra.gmra.mrb[12].mxu1 %v1275_v1  ;;  %vm604_vm12 = vcmp.eq.s32.totalorder %v3080_v5, %v5047_v62 }
 0x5de   :  { %v3469_v7 = vpop.f32.mrb[24].mxu0 }
 0x5df   :  { %v1260_v9 = vadd.f32 %v3469_v7, %v3120_v45  ;;  %v1251_v10 = vpop.f32.mrb[25].mxu0 }
 0x5e0   :  { %v1252_v12 = vadd.f32 %v3120_v45, %v1251_v10  ;;  %v3470_v13 = vpop.f32.mrb[26].mxu0 }
 0x5e1   :  { %v1263_v15 = vadd.f32 %v3470_v13, %v3120_v45  ;;  %v1254_v16 = vpop.f32.mrb[27].mxu0  ;;  %v1272_v20 = vmax.f32 %v1260_v9, 0.0 }
 0x5e2   :  { %v1255_v18 = vadd.f32 %v3120_v45, %v1254_v16  ;;  %v1270_v25 = vmax.f32 %v1252_v12, 0.0  ;;  %v3878_v16 = vld [vmem:[#allocation14 + $0x18] sm:$0xff]  }
 0x5e3   :  { %v1273_v21 = vmax.f32 %v1263_v15, 0.0 }
 0x5e4   :  { %v1271_v26 = vmax.f32 %v1255_v18, 0.0  ;;  %v3879_v18 = vld [vmem:[#allocation14 + $0x20] sm:$0xff]  }
 0x5e5   :  { %v1277_v29 = vpack.c.bf16 %v1273_v21, %v1272_v20  ;;  %v3880_v20 = vld [vmem:[#allocation14 + $0x28] sm:$0xff]   ;;  %v3881_v21 = vld [vmem:[#allocation14 + $0x30] sm:$0xff]  }
 0x5e6   :  { %v1276_v30 = vpack.c.bf16 %v1271_v26, %v1270_v25  ;;  %v3882_v25 = vld [vmem:[#allocation14 + $0x38] sm:$0xff]   ;;  %v3883_v26 = vld [vmem:[#allocation17] sm:$0xff]  }
 0x5e7   :  { %3528 = vmatpush3.bf16.msra.mxu0 %v3883_v26  ;;  %v3919_v26 = vld [vmem:[#allocation23 + $0x78] ss:$12 sps:$4 sm:$0xff]  }
 0x5e8   :  { %3491 = vmatprep.mubr.bf16.mxu1 %v1276_v30  ;;  %3529 = vmatprep.subr.bf16.mxu0 %v4671_v23  ;;  %v3885_v30 = vld [vmem:[#allocation17 + $0x10] sm:$0xff]  }
 0x5e9   :  { %3492 = vmatmul.mubr.bf16.gmra.mrb[16].mxu1 %v1277_v29  ;;  %v3884_v29 = vld [vmem:[#allocation17 + $0x8] sm:$0xff]  }
 0x5ea   :  { %3503 = vmatprep.mubr.msk.bf16.mxu1 %vm4672_vm0, %v4671_v23 }
 0x5eb   :  { %3530 = vmatpush3.bf16.msra.mxu0 %v3884_v29  ;;  %v3148_v29 = vld [vmem:[#allocation19] ss:$0 sm:$0xff] }
 0x5ec   :  { %3531 = vmatprep.subr.bf16.mxu0 %v4671_v23 }
 0x5ef   :  { %3532 = vmatpush3.bf16.msra.mxu0 %v3885_v30 }
 0x5f0   :  { %3533 = vmatprep.subr.bf16.mxu0 %v4671_v23 }
 0x6ac   :  { %v3489_v35 = vpop.f32.mrb[12].mxu1 }
 0x6ad   :  { %v1392_v36 = vadd.f32 %v3489_v35, %v3129_v32  ;;  %v1383_v39 = vpop.f32.mrb[13].mxu1  ;;  %v3887_v35 = vld [vmem:[#allocation17 + $0x20] sm:$0xff]  }
 0x6ae   :  { %v1384_v40 = vadd.f32 %v3129_v32, %v1383_v39  ;;  %v3490_v42 = vpop.f32.mrb[14].mxu1 }
 0x6af   :  { %v1416_v43 = vmul.f32 %v1392_v36, %v5125_v8  ;;  %v1395_v44 = vadd.f32 %v3490_v42, %v3129_v32  ;;  %v1386_v45 = vpop.f32.mrb[15].mxu1  ;;  %v3888_v36 = vld [vmem:[#allocation17 + $0x28] sm:$0xff]  }
 0x6b0   :  { %v1414_v46 = vmul.f32 %v1384_v40, %v5113_v56  ;;  %v1387_v47 = vadd.f32 %v3129_v32, %v1386_v45  ;;  %v3889_v45 = vld [vmem:[#allocation17 + $0x30] sm:$0xff]  }
 0x6b1   :  { %v1417_v48 = vmul.f32 %v1395_v44, %v5128_v11 }
 0x6b2   :  { %v1415_v49 = vmul.f32 %v1387_v47, %v5116_v59  ;;  %v598_v59 = vadd.s32 8, %v5047_v62  ;;  %v656_v47 = vsub.s32 2, %v5047_v62  ;;  %v3231_v62 = vld [vmem:[#allocation38] ss:$0 sm:$0xff] }
 0x6b3   :  { %v1423_v50 = vpack.c.bf16 %v1417_v48, %v1416_v43 }
 0x6b4   :  { %v1422_v51 = vpack.c.bf16 %v1415_v49, %v1414_v46  ;;  %vm605_vm13 = vcmp.eq.s32.totalorder %v3080_v5, %v598_v59  ;;  %v3890_v46 = vld [vmem:[#allocation17 + $0x38] sm:$0xff]   ;;  %v657_v48 = vrot.slane %v5051_v3, %v656_v47  ;;  %v3895_v5 = vld [vmem:[#allocation20 + $0x20] sm:$0xff]  }
 0x6b5   :  { %v3082_v13 = vsel %vm605_vm13, 1.0, %v4671_v23  ;;  %v3139_v49 = vld [vmem:[#allocation16] ss:$0 sm:$0xff]  ;;  %v3893_v3 = vld [vmem:[#allocation20 + $0x10] sm:$0xff]  }
 0x6b6   :  { %3496 = vmatpush3.bf16.msra.mxu1 %v1422_v51 }
 0x6b7   :  { %3497 = vmatprep.subr.bf16.mxu1 %v4671_v23 }
 0x6ba   :  { %3498 = vmatpush3.bf16.msra.mxu1 %v1423_v50  ;;  %v3731_v50 = vadd.f32 %v3139_v49, %v657_v48  ;;  %v3910_v48 = vld [vmem:[#allocation23 + $0x38] ss:$12 sps:$4 sm:$0xff]   ;;  %v3914_v49 = vld [vmem:[#allocation23 + $0x50] ss:$12 sps:$4 sm:$0xff]  }
 0x6bb   :  { %3499 = vmatprep.subr.bf16.mxu1 %v4671_v23 }
 0x6bc   :  { %v3493_v53 = vpop.f32.mrb[16].mxu1 }
 0x6bd   :  { %v1408_v8 = vadd.f32 %v3493_v53, %v3129_v32  ;;  %v1399_v55 = vpop.f32.mrb[17].mxu1 }
 0x6be   :  { %v1400_v57 = vadd.f32 %v3129_v32, %v1399_v55  ;;  %v3494_v58 = vpop.f32.mrb[18].mxu1 }
 0x6bf   :  { %v1420_v56 = vmul.f32 %v1408_v8, %v5149_v34  ;;  %v1411_v60 = vadd.f32 %v3494_v58, %v3129_v32  ;;  %v1402_v11 = vpop.f32.mrb[19].mxu1  ;;  %v3081_v34 = vsel %vm604_vm12, 1.0, %v4671_v23 }
 0x6c0   :  { %v1418_v61 = vmul.f32 %v1400_v57, %v5137_v19  ;;  %v1403_v1 = vadd.f32 %v3129_v32, %v1402_v11  ;;  %v5176_v15 = vpack.c.bf16 %v3082_v13, %v3081_v34  ;;  %v3875_v19 = vld [vmem:[#allocation14] sm:$0xff]   ;;  %v3901_v34 = vld [vmem:[#allocation23 + $0x4] ss:$12 sps:$4 sm:$0xff]  }
 0x6c1   :  { %v1421_v7 = vmul.f32 %v1411_v60, %v5152_v37  ;;  %v3877_v37 = vld [vmem:[#allocation14 + $0x10] sm:$0xff]   ;;  %v3886_v32 = vld [vmem:[#allocation17 + $0x18] sm:$0xff]   ;;  %v3891_v11 = vld [vmem:[#allocation20] sm:$0xff]  }
 0x6c2   :  { %v1419_v9 = vmul.f32 %v1403_v1, %v5140_v24  ;;  %v3876_v24 = vld [vmem:[#allocation14 + $0x8] sm:$0xff]   ;;  %3534 = vmatpush3.bf16.msra.mxu0 %v3886_v32  ;;  %v3894_v1 = vld [vmem:[#allocation20 + $0x18] sm:$0xff]  }
 0x6c3   :  { %v1425_v10 = vpack.c.bf16 %v1421_v7, %v1420_v56  ;;  %3535 = vmatprep.subr.bf16.mxu0 %v4671_v23  ;;  %v3896_v7 = vld [vmem:[#allocation20 + $0x28] sm:$0xff]  }
 0x6c4   :  { %v1424_v12 = vpack.c.bf16 %v1419_v9, %v1418_v61  ;;  %v3892_v61 = vld [vmem:[#allocation20 + $0x8] sm:$0xff]   ;;  %v3897_v9 = vld [vmem:[#allocation20 + $0x30] sm:$0xff]  }
 0x6c5   :  { %v3905_v13 = vld [vmem:[#allocation23 + $0x1c] ss:$12 sps:$4 sm:$0xff]  }
 0x6c6   :  { %3500 = vmatpush3.bf16.msra.mxu1 %v1424_v12  ;;  %3536 = vmatpush3.bf16.msra.mxu0 %v3887_v35  ;;  %v3899_v12 = vld [vmem:[#allocation23] ss:$12 sps:$4 sm:$0xff]  }
 0x6c7   :  { %3501 = vmatprep.subr.bf16.mxu1 %v4671_v23  ;;  %3537 = vmatprep.subr.bf16.mxu0 %v4671_v23 }
 0x6ca   :  { %3502 = vmatpush3.bf16.msra.mxu1 %v1425_v10  ;;  %3538 = vmatpush3.bf16.msra.mxu0 %v3888_v36  ;;  %v3898_v10 = vld [vmem:[#allocation20 + $0x38] sm:$0xff]  }
 0x6cb   :  { %3507 = vmatprep.subr.bf16.mxu1 %v4671_v23  ;;  %3539 = vmatprep.subr.bf16.mxu0 %v4671_v23 }
 0x6cd   :  { %3504 = vmatmul.mubr.msk.bf16.vlgmr.msra.gmra.mrb[20].mxu1 %vm1426_vm14, %v5176_v15 }
 0x6ce   :  { %3508 = vmatpush3.bf16.msra.mxu1 %v3875_v19  ;;  %3523 = vmatprep.mubr.msk.bf16.mxu1 %vm4672_vm0, %v4671_v23  ;;  %v3903_v19 = vld [vmem:[#allocation23 + $0x18] ss:$12 sps:$4 sm:$0xff]  }
 0x6cf   :  { %3509 = vmatprep.subr.bf16.mxu1 %v4671_v23  ;;  %3540 = vmatpush3.bf16.msra.mxu0 %v3889_v45 }
 0x6d0   :  { %3541 = vmatprep.subr.bf16.mxu0 %v4671_v23 }
 0x6d2   :  { %3510 = vmatpush3.bf16.msra.mxu1 %v3876_v24  ;;  %v3909_v24 = vld [vmem:[#allocation23 + $0x34] ss:$12 sps:$4 sm:$0xff]  }
 0x6d3   :  { %3511 = vmatprep.subr.bf16.mxu1 %v4671_v23  ;;  %3542 = vmatpush3.bf16.msra.mxu0 %v3890_v46  ;;  %v3906_v46 = vld [vmem:[#allocation23 + $0x20] ss:$12 sps:$4 sm:$0xff]  }
 0x6d4   :  { %3547 = vmatprep.subr.bf16.mxu0 %v4671_v23 }
 0x6d6   :  { %3512 = vmatpush3.bf16.msra.mxu1 %v3877_v37  ;;  %v3907_v37 = vld [vmem:[#allocation23 + $0x30] ss:$12 sps:$4 sm:$0xff]  }
 0x6d7   :  { %3513 = vmatprep.subr.bf16.mxu1 %v4671_v23 }
 0x6da   :  { %3514 = vmatpush3.bf16.msra.mxu1 %v3878_v16  ;;  %v3913_v16 = vld [vmem:[#allocation23 + $0x4c] ss:$12 sps:$4 sm:$0xff]  }
 0x6db   :  { %3515 = vmatprep.subr.bf16.mxu1 %v4671_v23 }
 0x6de   :  { %3516 = vmatpush3.bf16.msra.mxu1 %v3879_v18  ;;  %v3911_v18 = vld [vmem:[#allocation23 + $0x48] ss:$12 sps:$4 sm:$0xff]  }
 0x6df   :  { %3517 = vmatprep.subr.bf16.mxu1 %v4671_v23 }
 0x6e2   :  { %3518 = vmatpush3.bf16.msra.mxu1 %v3880_v20  ;;  %v3917_v20 = vld [vmem:[#allocation23 + $0x64] ss:$12 sps:$4 sm:$0xff]  }
 0x6e3   :  { %3519 = vmatprep.subr.bf16.mxu1 %v4671_v23 }
 0x6e6   :  { %3520 = vmatpush3.bf16.msra.mxu1 %v3881_v21  ;;  %v3915_v21 = vld [vmem:[#allocation23 + $0x60] ss:$12 sps:$4 sm:$0xff]  }
 0x6e7   :  { %3521 = vmatprep.subr.bf16.mxu1 %v4671_v23 }
 0x6ea   :  { %3522 = vmatpush3.bf16.msra.mxu1 %v3882_v25  ;;  %v3921_v25 = vld [vmem:[#allocation23 + $0x7c] ss:$12 sps:$4 sm:$0xff]  }
 0x6eb   :  { %1996 = vmatprep.subr.bf16.mxu1 %v3901_v34 }
 0x7a0   :  { %v1464_v39 = vpop.f32.mrb[20].mxu1 }
 0x7a1   :  { %v3505_v40 = vpop.f32.mrb[21].mxu1 }
 0x7a2   :  { %v1467_v42 = vpop.f32.mrb[22].mxu1 }
 0x7a3   :  { %v1471_v43 = vpack.c.bf16 %v1467_v42, %v1464_v39  ;;  %v3506_v44 = vpop.f32.mrb[23].mxu1 }
 0x7a4   :  { %v3902_v44 = vld [vmem:[#allocation23 + $0x8] ss:$12 sps:$4 sm:$0xff]  }
 0x7a5   :  { %3524 = vmatmul.mubr.bf16.vlgmr.msra.gmra.mrb[0].mxu1 %v1471_v43 }
 0x7a6   :  { %2028 = vmatprep.mubr.bf16.mxu1 %v4670_v0  ;;  %1997 = vmatpush1.bf16.msra.mxu1 %v3899_v12 }
 0x7a7   :  { %1998 = vmatprep.subr.bf16.mxu1 %v3905_v13  ;;  %v5230_v13 = vld [vmem:[%s5377_s27] sm:$0x7] }
 0x7aa   :  { %1999 = vmatpush1.bf16.msra.mxu1 %v3903_v19  ;;  %v1856_v19 = vrot.slane %v5230_v13, %v648_v2  ;;  %v3932_v2 = vld [vmem:[#allocation25 + $0x8] sm:$0xff]  }
 0x7ab   :  { %2000 = vmatprep.subr.bf16.mxu1 %v3909_v24 }
 0x7ae   :  { %2001 = vmatpush1.bf16.msra.mxu1 %v3907_v37  ;;  %v1860_v37 = vrot.slane %v5230_v13, %v652_v4  ;;  %v3933_v4 = vld [vmem:[#allocation25 + $0x10] sm:$0xff]  }
 0x7af   :  { %2002 = vmatprep.subr.bf16.mxu1 %v3913_v16 }
 0x7b2   :  { %2003 = vmatpush1.bf16.msra.mxu1 %v3911_v18 }
 0x7b3   :  { %2004 = vmatprep.subr.bf16.mxu1 %v3917_v20 }
 0x7b6   :  { %2005 = vmatpush1.bf16.msra.mxu1 %v3915_v21 }
 0x7b7   :  { %2006 = vmatprep.subr.bf16.mxu1 %v3921_v25 }
 0x7ba   :  { %2007 = vmatpush1.bf16.msra.mxu1 %v3919_v26 }
 0x878   :  { %v1577_v51 = vpop.f32.mrb[0].mxu1 }
 0x879   :  { %v3732_v53 = vadd.f32 %v3731_v50, %v1577_v51  ;;  %v3525_v8 = vpop.f32.mrb[1].mxu1  ;;  %v3922_v51 = vld [vmem:[#allocation23 + $0x80] ss:$12 sps:$4 sm:$0xff]  }
 0x87a   :  { %v1580_v55 = vpop.f32.mrb[2].mxu1  ;;  %v3923_v8 = vld [vmem:[#allocation23 + $0x90] ss:$12 sps:$4 sm:$0xff]  }
 0x87b   :  { %v3734_v57 = vadd.f32 %v3731_v50, %v1580_v55  ;;  %v3526_v58 = vpop.f32.mrb[3].mxu1  ;;  %v1586_v56 = vmax.f32 %v3732_v53, 0.0  ;;  %v3918_v50 = vld [vmem:[#allocation23 + $0x68] ss:$12 sps:$4 sm:$0xff]   ;;  %v3926_v55 = vld [vmem:[#allocation23 + $0x98] ss:$12 sps:$4 sm:$0xff]  }
 0x87c   :  { %v3925_v53 = vld [vmem:[#allocation23 + $0x94] ss:$12 sps:$4 sm:$0xff]  }
 0x87d   :  { %v1587_v60 = vmax.f32 %v3734_v57, 0.0  ;;  %2008 = vmatprep.subr.bf16.mxu1 %v3925_v53  ;;  %v3929_v57 = vld [vmem:[#allocation23 + $0xac] ss:$12 sps:$4 sm:$0xff]   ;;  %v3927_v58 = vld [vmem:[#allocation23 + $0xa8] ss:$12 sps:$4 sm:$0xff]  }
 0x87e   :  { %2009 = vmatpush1.bf16.msra.mxu1 %v3923_v8 }
 0x87f   :  { %v1588_v59 = vpack.c.bf16 %v1587_v60, %v1586_v56  ;;  %v3930_v56 = vld [vmem:[#allocation23 + $0xb0] ss:$12 sps:$4 sm:$0xff]   ;;  %2010 = vmatprep.subr.bf16.mxu1 %v3929_v57 }
 0x880   :  { %v3157_v60 = vld [vmem:[#allocation22] ss:$0 sm:$0xff] }
 0x881   :  { %3544 = vmatmul.mubr.bf16.vlgmr.msra.gmra.mrb[28].mxu0 %v1588_v59 }
 0x882   :  { %3548 = vmatpush3.bf16.msra.mxu0 %v3891_v11  ;;  %3563 = vmatprep.mubr.msk.bf16.mxu0 %vm4672_vm0, %v4671_v23 }
 0x883   :  { %3549 = vmatprep.subr.bf16.mxu0 %v4671_v23  ;;  %2011 = vmatpush1.bf16.msra.mxu1 %v3927_v58 }
 0x886   :  { %3550 = vmatpush3.bf16.msra.mxu0 %v3892_v61 }
 0x887   :  { %3551 = vmatprep.subr.bf16.mxu0 %v4671_v23 }
 0x88a   :  { %3552 = vmatpush3.bf16.msra.mxu0 %v3893_v3 }
 0x88b   :  { %3553 = vmatprep.subr.bf16.mxu0 %v4671_v23 }
 0x88e   :  { %3554 = vmatpush3.bf16.msra.mxu0 %v3894_v1 }
 0x88f   :  { %3555 = vmatprep.subr.bf16.mxu0 %v4671_v23 }
 0x892   :  { %3556 = vmatpush3.bf16.msra.mxu0 %v3895_v5 }
 0x893   :  { %3557 = vmatprep.subr.bf16.mxu0 %v4671_v23 }
 0x896   :  { %3558 = vmatpush3.bf16.msra.mxu0 %v3896_v7  ;;  %v3979_v7 = vld [vmem:[#allocation2] sm:$0xff] }
 0x897   :  { %3559 = vmatprep.subr.bf16.mxu0 %v4671_v23 }
 0x89a   :  { %3560 = vmatpush3.bf16.msra.mxu0 %v3897_v9 }
 0x89b   :  { %3561 = vmatprep.subr.bf16.mxu0 %v4671_v23 }
 0x89e   :  { %3562 = vmatpush3.bf16.msra.mxu0 %v3898_v10  ;;  %v3980_v10 = vld [vmem:[#allocation2 + $0x8] sm:$0xff] }
 0x89f   :  { %3567 = vmatprep.subr.bf16.mxu0 %v4671_v23 }
 0x954   :  { %v1694_v30 = vpop.f32.mrb[28].mxu0 }
 0x955   :  { %v1695_v32 = vadd.f32 %v3148_v29, %v1694_v30  ;;  %v3545_v35 = vpop.f32.mrb[29].mxu0 }
 0x956   :  { %v1697_v36 = vpop.f32.mrb[30].mxu0  ;;  %v3931_v35 = vld [vmem:[#allocation25] sm:$0xff]  }
 0x957   :  { %v1698_v39 = vadd.f32 %v3148_v29, %v1697_v36  ;;  %v3546_v40 = vpop.f32.mrb[31].mxu0  ;;  %v1701_v42 = vmax.f32 %v1695_v32, 0.0  ;;  %v3934_v36 = vld [vmem:[#allocation25 + $0x18] sm:$0xff]  }
 0x958   :  { %v3939_v40 = vld [vmem:[#allocation28] sm:$0xff]  }
 0x959   :  { %v1702_v43 = vmax.f32 %v1698_v39, 0.0  ;;  %v3938_v39 = vld [vmem:[#allocation25 + $0x38] sm:$0xff]  }
 0x95b   :  { %v1703_v45 = vpack.c.bf16 %v1702_v43, %v1701_v42  ;;  %v3940_v42 = vld [vmem:[#allocation28 + $0x8] sm:$0xff]  }
 0x95c   :  { %v3944_v43 = vld [vmem:[#allocation28 + $0x28] sm:$0xff]  }
 0x95d   :  { %3564 = vmatmul.mubr.bf16.vlgmr.msra.gmra.mrb[32].mxu0 %v1703_v45 }
 0x95e   :  { %3568 = vmatpush3.bf16.msra.mxu0 %v3902_v44  ;;  %3583 = vmatprep.mubr.msk.bf16.mxu0 %vm4672_vm0, %v4671_v23 }
 0x95f   :  { %3569 = vmatprep.subr.bf16.mxu0 %v4671_v23 }
 0x962   :  { %3570 = vmatpush3.bf16.msra.mxu0 %v3906_v46 }
 0x963   :  { %3571 = vmatprep.subr.bf16.mxu0 %v4671_v23 }
 0x966   :  { %3572 = vmatpush3.bf16.msra.mxu0 %v3910_v48 }
 0x967   :  { %3573 = vmatprep.subr.bf16.mxu0 %v4671_v23 }
 0x96a   :  { %3574 = vmatpush3.bf16.msra.mxu0 %v3914_v49 }
 0x96b   :  { %3575 = vmatprep.subr.bf16.mxu0 %v4671_v23 }
 0x96e   :  { %3576 = vmatpush3.bf16.msra.mxu0 %v3918_v50 }
 0x96f   :  { %3577 = vmatprep.subr.bf16.mxu0 %v4671_v23 }
 0x972   :  { %3578 = vmatpush3.bf16.msra.mxu0 %v3922_v51 }
 0x973   :  { %3579 = vmatprep.subr.bf16.mxu0 %v4671_v23 }
 0x976   :  { %3580 = vmatpush3.bf16.msra.mxu0 %v3926_v55 }
 0x977   :  { %3581 = vmatprep.subr.bf16.mxu0 %v4671_v23 }
 0x97a   :  { %3582 = vmatpush3.bf16.msra.mxu0 %v3930_v56 }
 0x97b   :  { %3611 = vmatprep.subr.bf16.mxu0 %v3939_v40 }
 0xa30   :  { %v1809_v11 = vpop.f32.mrb[32].mxu0 }
 0xa31   :  { %v1810_v59 = vadd.f32 %v3157_v60, %v1809_v11  ;;  %v3565_v61 = vpop.f32.mrb[33].mxu0 }
 0xa32   :  { %v1812_v3 = vpop.f32.mrb[34].mxu0 }
 0xa33   :  { %v1813_v1 = vadd.f32 %v3157_v60, %v1812_v3  ;;  %v3566_v5 = vpop.f32.mrb[35].mxu0  ;;  %v5222_v9 = vadd.f32 %v3979_v7, %v1810_v59 }
 0xa35   :  { %v5224_v12 = vadd.f32 %v3980_v10, %v1813_v1 }
 0xa37   :  { %v1818_v34 = vpack.c.bf16 %v5224_v12, %v5222_v9 }
 0xa39   :  { %2029 = vmatmul.mubr.bf16.vlgmr.msra.gmra.mrb[24].mxu1 %v1818_v34  ;;  %3584 = vmatmul.mubr.bf16.vlgmr.msra.gmra.mrb[36].mxu0 %v1818_v34 }
 0xa3a   :  { %2082 = vmatprep.subr.bf16.mxu1 %v1818_v34  ;;  %2114 = vmatprep.mubr.bf16.mxu1 %v4670_v0 }
 0xa3b   :  { %3612 = vmatpush3.bf16.msra.mxu0 %v3939_v40 }
 0xa3c   :  { %3613 = vmatprep.subr.bf16.mxu0 %v3940_v42 }
 0xa3f   :  { %3614 = vmatpush3.bf16.msra.mxu0 %v3940_v42 }
 0xb0c   :  { %v2030_v24 = vpop.f32.mrb[24].mxu1 }
 0xb0d   :  { %v2032_v16 = vpop.f32.mrb[25].mxu1  ;;  %v2031_v20 = vadd.f32 %v2030_v24, %v1856_v19 }
 0xb0e   :  { %v2034_v18 = vpop.f32.mrb[26].mxu1  ;;  %v2033_v26 = vadd.f32 %v2032_v16, %v1860_v37 }
 0xb0f   :  { %v2035_v21 = vadd.f32 %v2034_v18, %v1856_v19  ;;  %v2036_v25 = vpop.f32.mrb[27].mxu1 }
 0xb10   :  { %v2037_v29 = vadd.f32 %v2036_v25, %v1860_v37 }
 0xb11   :  { %v2080_v30 = vpack.c.bf16 %v2035_v21, %v2031_v20 }
 0xb12   :  { %v2081_v32 = vpack.c.bf16 %v2037_v29, %v2033_v26  ;;  %v3946_v26 = vld [vmem:[#allocation28 + $0x38] sm:$0xff]   ;;  %v3948_v29 = vld [vmem:[#allocation31 + $0x8] sm:$0xff]  }
 0xb13   :  { %2083 = vmatpush1.bf16.msra.mxu1 %v2080_v30  ;;  %v3950_v30 = vld [vmem:[#allocation31 + $0x18] sm:$0xff]  }
 0xb14   :  { %2084 = vmatprep.subr.bf16.mxu1 %v4673_v22  ;;  %v3935_v22 = vld [vmem:[#allocation25 + $0x20] sm:$0xff]  }
 0xb17   :  { %2085 = vmatpush1.bf16.msra.mxu1 %v2081_v32  ;;  %v3951_v32 = vld [vmem:[#allocation31 + $0x20] sm:$0xff]  }
 0xb18   :  { %3587 = vmatprep.subr.bf16.mxu1 %v3931_v35 }
 0xb1a   :  { %3190 = vmatmul.mubr.msk.bf16.vlgmr.msra.gmra.mrb[28].mxu1 %vm876_vm11, %v5073_v27  ;;  %v3936_v27 = vld [vmem:[#allocation25 + $0x28] sm:$0xff]  }
 0xb1b   :  { %2124 = vmatprep.mubr.bf16.mxu1 %v4670_v0  ;;  %3588 = vmatpush3.bf16.msra.mxu1 %v3931_v35  ;;  %v3952_v35 = vld [vmem:[#allocation31 + $0x28] sm:$0xff]  }
 0xb1c   :  { %3589 = vmatprep.subr.bf16.mxu1 %v3932_v2 }
 0xb1f   :  { %3590 = vmatpush3.bf16.msra.mxu1 %v3932_v2  ;;  %v3194_v2 = vld [vmem:[#allocation26] ss:$0 sm:$0xff] }
 0xb20   :  { %3591 = vmatprep.subr.bf16.mxu1 %v3933_v4 }
 0xb22   :  { %3191 = vmatmul.mubr.msk.bf16.gmra.mrb[32].mxu1 %vm876_vm11, %v5084_v33  ;;  %v3937_v33 = vld [vmem:[#allocation25 + $0x30] sm:$0xff]  }
 0xb23   :  { %2134 = vmatprep.mubr.bf16.mxu1 %v4670_v0  ;;  %3592 = vmatpush3.bf16.msra.mxu1 %v3933_v4 }
 0xb24   :  { %3593 = vmatprep.subr.bf16.mxu1 %v3934_v36 }
 0xb27   :  { %3594 = vmatpush3.bf16.msra.mxu1 %v3934_v36 }
 0xb28   :  { %3595 = vmatprep.subr.bf16.mxu1 %v3935_v22 }
 0xb2a   :  { %3192 = vmatmul.mubr.msk.bf16.gmra.mrb[36].mxu1 %vm876_vm11, %v5095_v38  ;;  %v3942_v38 = vld [vmem:[#allocation28 + $0x18] sm:$0xff]  }
 0xb2b   :  { %2144 = vmatprep.mubr.bf16.mxu1 %v4670_v0  ;;  %3596 = vmatpush3.bf16.msra.mxu1 %v3935_v22  ;;  %v3941_v0 = vld [vmem:[#allocation28 + $0x10] sm:$0xff]  }
 0xb2c   :  { %3597 = vmatprep.subr.bf16.mxu1 %v3936_v27  ;;  %3615 = vmatprep.subr.bf16.mxu0 %v3941_v0 }
 0xb2d   :  { %3616 = vmatpush3.bf16.msra.mxu0 %v3941_v0 }
 0xb2e   :  { %3617 = vmatprep.subr.bf16.mxu0 %v3942_v38 }
 0xb2f   :  { %3598 = vmatpush3.bf16.msra.mxu1 %v3936_v27 }
 0xb30   :  { %3599 = vmatprep.subr.bf16.mxu1 %v3937_v33 }
 0xb31   :  { %3618 = vmatpush3.bf16.msra.mxu0 %v3942_v38 }
 0xb32   :  { %3193 = vmatmul.mubr.msk.bf16.gmra.mrb[40].mxu1 %vm876_vm11, %v5102_v41  ;;  %v3943_v41 = vld [vmem:[#allocation28 + $0x20] sm:$0xff]  }
 0xb33   :  { %3600 = vmatpush3.bf16.msra.mxu1 %v3937_v33  ;;  %3619 = vmatprep.subr.bf16.mxu0 %v3943_v41 }
 0xb34   :  { %3601 = vmatprep.subr.bf16.mxu1 %v3938_v39 }
 0xb35   :  { %3620 = vmatpush3.bf16.msra.mxu0 %v3943_v41 }
 0xb36   :  { %3621 = vmatprep.subr.bf16.mxu0 %v3944_v43 }
 0xb37   :  { %3602 = vmatpush3.bf16.msra.mxu1 %v3938_v39 }
 0xb39   :  { %3622 = vmatpush3.bf16.msra.mxu0 %v3944_v43 }
 0xbed   :  { %v2116_v44 = vpop.f32.mrb[28].mxu1 }
 0xbee   :  { %v2155_v45 = vadd.f32 %v2116_v44, %v5107_v52  ;;  %v5251_v46 = vpop.f32.mrb[29].mxu1 }
 0xbef   :  { %v2120_v48 = vpop.f32.mrb[30].mxu1 }
 0xbf0   :  { %v2156_v49 = vadd.f32 %v2120_v48, %v5110_v54  ;;  %v5254_v50 = vpop.f32.mrb[31].mxu1  ;;  %v2163_v51 = vmax.f32 %v2155_v45, 0.0 }
 0xbf2   :  { %v2164_v53 = vmax.f32 %v2156_v49, 0.0 }
 0xbf4   :  { %v2171_v8 = vpack.c.bf16 %v2164_v53, %v2163_v51 }
 0xbf5   :  { %v2126_v55 = vpop.f32.mrb[32].mxu1 }
 0xbf6   :  { %v2157_v57 = vadd.f32 %v2126_v55, %v5119_v63  ;;  %v5257_v58 = vpop.f32.mrb[33].mxu1  ;;  %3603 = vmatprep.mubr.bf16.mxu1 %v2171_v8 }
 0xbf7   :  { %v2130_v56 = vpop.f32.mrb[34].mxu1 }
 0xbf8   :  { %v2158_v60 = vadd.f32 %v2130_v56, %v5122_v6  ;;  %v5260_v52 = vpop.f32.mrb[35].mxu1  ;;  %v2165_v11 = vmax.f32 %v2157_v57, 0.0 }
 0xbfa   :  { %v2166_v59 = vmax.f32 %v2158_v60, 0.0 }
 0xbfc   :  { %v2172_v61 = vpack.c.bf16 %v2166_v59, %v2165_v11 }
 0xbfd   :  { %v2136_v54 = vpop.f32.mrb[36].mxu1 }
 0xbfe   :  { %v2159_v3 = vadd.f32 %v2136_v54, %v5131_v14  ;;  %v5263_v1 = vpop.f32.mrb[37].mxu1  ;;  %3604 = vmatmul.mubr.bf16.vlgmr.msra.gmra.mrb[44].mxu1 %v2172_v61 }
 0xbff   :  { %v2140_v5 = vpop.f32.mrb[38].mxu1 }
 0xc00   :  { %v2160_v63 = vadd.f32 %v2140_v5, %v5134_v17  ;;  %v5266_v7 = vpop.f32.mrb[39].mxu1  ;;  %v2167_v10 = vmax.f32 %v2159_v3, 0.0  ;;  %v3945_v17 = vld [vmem:[#allocation28 + $0x30] sm:$0xff]  }
 0xc01   :  { %3623 = vmatprep.subr.bf16.mxu0 %v3945_v17  ;;  %v3953_v5 = vld [vmem:[#allocation31 + $0x30] sm:$0xff]  }
 0xc02   :  { %v2168_v34 = vmax.f32 %v2160_v63, 0.0  ;;  %3624 = vmatpush3.bf16.msra.mxu0 %v3945_v17  ;;  %v3954_v63 = vld [vmem:[#allocation31 + $0x38] sm:$0xff]  }
 0xc03   :  { %3625 = vmatprep.subr.bf16.mxu0 %v3946_v26 }
 0xc04   :  { %v2173_v19 = vpack.c.bf16 %v2168_v34, %v2167_v10  ;;  %v3203_v10 = vld [vmem:[#allocation29] ss:$0 sm:$0xff] }
 0xc05   :  { %v2146_v6 = vpop.f32.mrb[40].mxu1 }
 0xc06   :  { %v2161_v24 = vadd.f32 %v2146_v6, %v5143_v28  ;;  %v5269_v37 = vpop.f32.mrb[41].mxu1  ;;  %3607 = vmatprep.mubr.bf16.mxu1 %v2173_v19  ;;  %3626 = vmatpush3.bf16.msra.mxu0 %v3946_v26  ;;  %v3947_v28 = vld [vmem:[#allocation31] sm:$0xff]  }
 0xc07   :  { %v2150_v16 = vpop.f32.mrb[42].mxu1  ;;  %3659 = vmatprep.subr.bf16.mxu0 %v4671_v23  ;;  %3635 = vmatprep.subr.bf16.mxu1 %v3947_v28 }
 0xc08   :  { %v2162_v14 = vadd.f32 %v2150_v16, %v5146_v31  ;;  %v5272_v18 = vpop.f32.mrb[43].mxu1  ;;  %v2169_v20 = vmax.f32 %v2161_v24, 0.0  ;;  %3636 = vmatpush3.bf16.msra.mxu1 %v3947_v28  ;;  %v3949_v31 = vld [vmem:[#allocation31 + $0x10] sm:$0xff]  }
 0xc09   :  { %3637 = vmatprep.subr.bf16.mxu1 %v3948_v29 }
 0xc0a   :  { %v2170_v21 = vmax.f32 %v2162_v14, 0.0 }
 0xc0c   :  { %v2174_v25 = vpack.c.bf16 %v2170_v21, %v2169_v20  ;;  %3638 = vmatpush3.bf16.msra.mxu1 %v3948_v29 }
 0xc0d   :  { %3639 = vmatprep.subr.bf16.mxu1 %v3949_v31 }
 0xc0e   :  { %3608 = vmatmul.mubr.bf16.gmra.mrb[48].mxu1 %v2174_v25 }
 0xc10   :  { %3640 = vmatpush3.bf16.msra.mxu1 %v3949_v31 }
 0xc11   :  { %3641 = vmatprep.subr.bf16.mxu1 %v3950_v30 }
 0xc14   :  { %3642 = vmatpush3.bf16.msra.mxu1 %v3950_v30 }
 0xc15   :  { %3643 = vmatprep.subr.bf16.mxu1 %v3951_v32 }
 0xc18   :  { %3644 = vmatpush3.bf16.msra.mxu1 %v3951_v32 }
 0xc19   :  { %3645 = vmatprep.subr.bf16.mxu1 %v3952_v35 }
 0xc1c   :  { %3646 = vmatpush3.bf16.msra.mxu1 %v3952_v35 }
 0xc1d   :  { %3647 = vmatprep.subr.bf16.mxu1 %v3953_v5 }
 0xc20   :  { %3648 = vmatpush3.bf16.msra.mxu1 %v3953_v5 }
 0xc21   :  { %3649 = vmatprep.subr.bf16.mxu1 %v3954_v63 }
 0xc24   :  { %3650 = vmatpush3.bf16.msra.mxu1 %v3954_v63 }
 0xc25   :  { %3691 = vmatprep.subr.bf16.mxu1 %v4671_v23 }
 0xcd1   :  { %v3605_v4 = vpop.f32.mrb[44].mxu1 }
 0xcd2   :  { %v2289_v36 = vadd.f32 %v3605_v4, %v3194_v2  ;;  %v2280_v22 = vpop.f32.mrb[45].mxu1 }
 0xcd3   :  { %v2281_v27 = vadd.f32 %v3194_v2, %v2280_v22  ;;  %v3606_v33 = vpop.f32.mrb[46].mxu1 }
 0xcd4   :  { %v2292_v39 = vadd.f32 %v3606_v33, %v3194_v2  ;;  %v2283_v40 = vpop.f32.mrb[47].mxu1  ;;  %v2313_v0 = vmax.f32 %v2289_v36, 0.0 }
 0xcd5   :  { %v2284_v42 = vadd.f32 %v3194_v2, %v2283_v40  ;;  %v2311_v41 = vmax.f32 %v2281_v27, 0.0 }
 0xcd6   :  { %v2314_v38 = vmax.f32 %v2292_v39, 0.0 }
 0xcd7   :  { %v2312_v43 = vmax.f32 %v2284_v42, 0.0 }
 0xcd8   :  { %v2320_v44 = vpack.c.bf16 %v2314_v38, %v2313_v0 }
 0xcd9   :  { %v2319_v45 = vpack.c.bf16 %v2312_v43, %v2311_v41  ;;  %v3212_v41 = vld [vmem:[#allocation32] ss:$0 sm:$0xff] }
 0xcdb   :  { %3627 = vmatprep.mubr.bf16.mxu0 %v2319_v45 }
 0xcdc   :  { %3628 = vmatmul.mubr.bf16.vlgmr.msra.gmra.mrb[40].mxu0 %v2320_v44 }
 0xce1   :  { %v3609_v48 = vpop.f32.mrb[48].mxu1 }
 0xce2   :  { %v2305_v49 = vadd.f32 %v3609_v48, %v3194_v2  ;;  %v2296_v51 = vpop.f32.mrb[49].mxu1 }
 0xce3   :  { %v2297_v53 = vadd.f32 %v3194_v2, %v2296_v51  ;;  %v3610_v8 = vpop.f32.mrb[50].mxu1 }
 0xce4   :  { %v2308_v55 = vadd.f32 %v3610_v8, %v3194_v2  ;;  %v2299_v57 = vpop.f32.mrb[51].mxu1  ;;  %v2317_v60 = vmax.f32 %v2305_v49, 0.0 }
 0xce5   :  { %v2300_v56 = vadd.f32 %v3194_v2, %v2299_v57  ;;  %v2315_v59 = vmax.f32 %v2297_v53, 0.0 }
 0xce6   :  { %v2318_v11 = vmax.f32 %v2308_v55, 0.0 }
 0xce7   :  { %v2316_v61 = vmax.f32 %v2300_v56, 0.0 }
 0xce8   :  { %v2322_v54 = vpack.c.bf16 %v2318_v11, %v2317_v60 }
 0xce9   :  { %v2321_v3 = vpack.c.bf16 %v2316_v61, %v2315_v59 }
 0xceb   :  { %3631 = vmatprep.mubr.bf16.mxu0 %v2321_v3 }
 0xcec   :  { %3632 = vmatmul.mubr.bf16.gmra.mrb[44].mxu0 %v2322_v54 }
 0xced   :  { %3667 = vmatprep.mubr.msk.bf16.mxu0 %vm4672_vm0, %v4671_v23 }
 0xdaf   :  { %v3629_v34 = vpop.f32.mrb[40].mxu0 }
 0xdb0   :  { %v2437_v19 = vadd.f32 %v3629_v34, %v3203_v10  ;;  %v2428_v6 = vpop.f32.mrb[41].mxu0 }
 0xdb1   :  { %v2429_v24 = vadd.f32 %v3203_v10, %v2428_v6  ;;  %v3630_v16 = vpop.f32.mrb[42].mxu0 }
 0xdb2   :  { %v2440_v14 = vadd.f32 %v3630_v16, %v3203_v10  ;;  %v2431_v20 = vpop.f32.mrb[43].mxu0  ;;  %v2461_v25 = vmax.f32 %v2437_v19, 0.0  ;;  %v3955_v16 = vld [vmem:[#allocation34] sm:$0xff]  }
 0xdb3   :  { %v2432_v21 = vadd.f32 %v3203_v10, %v2431_v20  ;;  %v2459_v26 = vmax.f32 %v2429_v24, 0.0  ;;  %v3962_v20 = vld [vmem:[#allocation34 + $0x38] sm:$0xff]  }
 0xdb4   :  { %v2462_v17 = vmax.f32 %v2440_v14, 0.0  ;;  %v3961_v14 = vld [vmem:[#allocation34 + $0x30] sm:$0xff]  }
 0xdb5   :  { %v2460_v28 = vmax.f32 %v2432_v21, 0.0  ;;  %v3963_v21 = vld [vmem:[#allocation37] sm:$0xff]  }
 0xdb6   :  { %v2468_v29 = vpack.c.bf16 %v2462_v17, %v2461_v25  ;;  %v3964_v25 = vld [vmem:[#allocation37 + $0x8] sm:$0xff]   ;;  %v3965_v17 = vld [vmem:[#allocation37 + $0x10] sm:$0xff]  }
 0xdb7   :  { %v2467_v31 = vpack.c.bf16 %v2460_v28, %v2459_v26  ;;  %v3966_v26 = vld [vmem:[#allocation37 + $0x18] sm:$0xff]   ;;  %v3967_v28 = vld [vmem:[#allocation37 + $0x20] sm:$0xff]  }
 0xdb9   :  { %3651 = vmatprep.mubr.bf16.mxu1 %v2467_v31 }
 0xdba   :  { %3652 = vmatmul.mubr.bf16.vlgmr.msra.gmra.mrb[52].mxu1 %v2468_v29  ;;  %v3968_v29 = vld [vmem:[#allocation37 + $0x28] sm:$0xff]  }
 0xdbb   :  { %3692 = vmatpush3.bf16.msra.mxu1 %v3963_v21 }
 0xdbc   :  { %3693 = vmatprep.subr.bf16.mxu1 %v4671_v23 }
 0xdbf   :  { %v3633_v30 = vpop.f32.mrb[44].mxu0  ;;  %3694 = vmatpush3.bf16.msra.mxu1 %v3964_v25 }
 0xdc0   :  { %v2453_v32 = vadd.f32 %v3633_v30, %v3203_v10  ;;  %v2444_v35 = vpop.f32.mrb[45].mxu0  ;;  %3695 = vmatprep.subr.bf16.mxu1 %v4671_v23 }
 0xdc1   :  { %v2445_v2 = vadd.f32 %v3203_v10, %v2444_v35  ;;  %v3634_v4 = vpop.f32.mrb[46].mxu0 }
 0xdc2   :  { %v2456_v36 = vadd.f32 %v3634_v4, %v3203_v10  ;;  %v2447_v22 = vpop.f32.mrb[47].mxu0  ;;  %v2465_v33 = vmax.f32 %v2453_v32, 0.0  ;;  %v3969_v4 = vld [vmem:[#allocation37 + $0x30] sm:$0xff]  }
 0xdc3   :  { %v2448_v27 = vadd.f32 %v3203_v10, %v2447_v22  ;;  %v2463_v40 = vmax.f32 %v2445_v2, 0.0  ;;  %3696 = vmatpush3.bf16.msra.mxu1 %v3965_v17  ;;  %v3971_v22 = vld [vmem:[#allocation40] sm:$0xff]  }
 0xdc4   :  { %v2466_v39 = vmax.f32 %v2456_v36, 0.0  ;;  %3697 = vmatprep.subr.bf16.mxu1 %v4671_v23  ;;  %v3970_v36 = vld [vmem:[#allocation37 + $0x38] sm:$0xff]  }
 0xdc5   :  { %v2464_v42 = vmax.f32 %v2448_v27, 0.0  ;;  %v3972_v27 = vld [vmem:[#allocation40 + $0x8] sm:$0xff]  }
 0xdc6   :  { %v2470_v0 = vpack.c.bf16 %v2466_v39, %v2465_v33  ;;  %v3973_v33 = vld [vmem:[#allocation40 + $0x10] sm:$0xff]   ;;  %v3974_v39 = vld [vmem:[#allocation40 + $0x18] sm:$0xff]  }
 0xdc7   :  { %v2469_v38 = vpack.c.bf16 %v2464_v42, %v2463_v40  ;;  %3698 = vmatpush3.bf16.msra.mxu1 %v3966_v26  ;;  %v3975_v40 = vld [vmem:[#allocation40 + $0x20] sm:$0xff]   ;;  %v3976_v42 = vld [vmem:[#allocation40 + $0x28] sm:$0xff]  }
 0xdc8   :  { %3699 = vmatprep.subr.bf16.mxu1 %v4671_v23 }
 0xdc9   :  { %3655 = vmatprep.mubr.bf16.mxu1 %v2469_v38  ;;  %v3222_v38 = vld [vmem:[#allocation35] ss:$0 sm:$0xff] }
 0xdca   :  { %3656 = vmatmul.mubr.bf16.gmra.mrb[56].mxu1 %v2470_v0  ;;  %v1864_v0 = vrot.slane %v5230_v13, %v656_v47 }
 0xdcb   :  { %3707 = vmatprep.mubr.msk.bf16.mxu1 %vm4672_vm0, %v4671_v23  ;;  %3700 = vmatpush3.bf16.msra.mxu1 %v3967_v28 }
 0xdcc   :  { %3701 = vmatprep.subr.bf16.mxu1 %v4671_v23 }
 0xdcf   :  { %3702 = vmatpush3.bf16.msra.mxu1 %v3968_v29 }
 0xdd0   :  { %3703 = vmatprep.subr.bf16.mxu1 %v4671_v23 }
 0xdd3   :  { %3704 = vmatpush3.bf16.msra.mxu1 %v3969_v4 }
 0xdd4   :  { %3705 = vmatprep.subr.bf16.mxu1 %v4671_v23 }
 0xdd7   :  { %3706 = vmatpush3.bf16.msra.mxu1 %v3970_v36 }
 0xe8d   :  { %v3653_v43 = vpop.f32.mrb[52].mxu1 }
 0xe8e   :  { %v2585_v44 = vadd.f32 %v3653_v43, %v3212_v41  ;;  %v2576_v45 = vpop.f32.mrb[53].mxu1 }
 0xe8f   :  { %v2577_v48 = vadd.f32 %v3212_v41, %v2576_v45  ;;  %v3654_v49 = vpop.f32.mrb[54].mxu1 }
 0xe90   :  { %v2609_v51 = vmul.f32 %v2585_v44, %v5257_v58  ;;  %v2588_v53 = vadd.f32 %v3654_v49, %v3212_v41  ;;  %v2579_v8 = vpop.f32.mrb[55].mxu1 }
 0xe91   :  { %v2607_v55 = vmul.f32 %v2577_v48, %v5251_v46  ;;  %v2580_v57 = vadd.f32 %v3212_v41, %v2579_v8 }
 0xe92   :  { %v2610_v56 = vmul.f32 %v2588_v53, %v5260_v52 }
 0xe93   :  { %v2608_v60 = vmul.f32 %v2580_v57, %v5254_v50  ;;  %v3977_v57 = vld [vmem:[#allocation40 + $0x30] sm:$0xff]  }
 0xe94   :  { %v2616_v11 = vpack.c.bf16 %v2610_v56, %v2609_v51  ;;  %v3978_v56 = vld [vmem:[#allocation40 + $0x38] sm:$0xff]  }
 0xe95   :  { %v2615_v59 = vpack.c.bf16 %v2608_v60, %v2607_v55 }
 0xe97   :  { %3660 = vmatpush3.bf16.msra.mxu0 %v2615_v59 }
 0xe98   :  { %3661 = vmatprep.subr.bf16.mxu0 %v4671_v23 }
 0xe9b   :  { %3662 = vmatpush3.bf16.msra.mxu0 %v2616_v11 }
 0xe9c   :  { %3663 = vmatprep.subr.bf16.mxu0 %v4671_v23 }
 0xe9d   :  { %v3657_v61 = vpop.f32.mrb[56].mxu1 }
 0xe9e   :  { %v2601_v54 = vadd.f32 %v3657_v61, %v3212_v41  ;;  %v2592_v58 = vpop.f32.mrb[57].mxu1 }
 0xe9f   :  { %v2593_v3 = vadd.f32 %v3212_v41, %v2592_v58  ;;  %v3658_v5 = vpop.f32.mrb[58].mxu1 }
 0xea0   :  { %v2613_v46 = vmul.f32 %v2601_v54, %v5269_v37  ;;  %v2604_v63 = vadd.f32 %v3658_v5, %v3212_v41  ;;  %v2595_v10 = vpop.f32.mrb[59].mxu1  ;;  %v3956_v37 = vld [vmem:[#allocation34 + $0x8] sm:$0xff]   ;;  %v3240_v5 = vld [vmem:[#allocation41] ss:$0 sm:$0xff] }
 0xea1   :  { %v2611_v52 = vmul.f32 %v2593_v3, %v5263_v1  ;;  %v2596_v50 = vadd.f32 %v3212_v41, %v2595_v10  ;;  %v3957_v1 = vld [vmem:[#allocation34 + $0x10] sm:$0xff]   ;;  %v3735_v41 = vadd.f32 %v3222_v38, %v1864_v0 }
 0xea2   :  { %v2614_v34 = vmul.f32 %v2604_v63, %v5272_v18  ;;  %v3959_v18 = vld [vmem:[#allocation34 + $0x20] sm:$0xff]  }
 0xea3   :  { %v2612_v19 = vmul.f32 %v2596_v50, %v5266_v7  ;;  %v3958_v7 = vld [vmem:[#allocation34 + $0x18] sm:$0xff]  }
 0xea4   :  { %v2618_v6 = vpack.c.bf16 %v2614_v34, %v2613_v46 }
 0xea5   :  { %v2617_v24 = vpack.c.bf16 %v2612_v19, %v2611_v52 }
 0xea7   :  { %3664 = vmatpush3.bf16.msra.mxu0 %v2617_v24 }
 0xea8   :  { %3665 = vmatprep.subr.bf16.mxu0 %v4671_v23 }
 0xeab   :  { %3666 = vmatpush3.bf16.msra.mxu0 %v2618_v6 }
 0xeac   :  { %3671 = vmatprep.subr.bf16.mxu0 %v4671_v23 }
 0xeae   :  { %3668 = vmatmul.mubr.msk.bf16.vlgmr.msra.gmra.mrb[48].mxu0 %vm1426_vm14, %v5176_v15  ;;  %v3960_v15 = vld [vmem:[#allocation34 + $0x28] sm:$0xff]  }
 0xeaf   :  { %3672 = vmatpush3.bf16.msra.mxu0 %v3955_v16  ;;  %3687 = vmatprep.mubr.msk.bf16.mxu0 %vm4672_vm0, %v4671_v23 }
 0xeb0   :  { %3673 = vmatprep.subr.bf16.mxu0 %v4671_v23 }
 0xeb3   :  { %3674 = vmatpush3.bf16.msra.mxu0 %v3956_v37 }
 0xeb4   :  { %3675 = vmatprep.subr.bf16.mxu0 %v4671_v23 }
 0xeb7   :  { %3676 = vmatpush3.bf16.msra.mxu0 %v3957_v1 }
 0xeb8   :  { %3677 = vmatprep.subr.bf16.mxu0 %v4671_v23 }
 0xebb   :  { %3678 = vmatpush3.bf16.msra.mxu0 %v3958_v7 }
 0xebc   :  { %3679 = vmatprep.subr.bf16.mxu0 %v4671_v23 }
 0xebf   :  { %3680 = vmatpush3.bf16.msra.mxu0 %v3959_v18 }
 0xec0   :  { %3681 = vmatprep.subr.bf16.mxu0 %v4671_v23 }
 0xec3   :  { %3682 = vmatpush3.bf16.msra.mxu0 %v3960_v15 }
 0xec4   :  { %3683 = vmatprep.subr.bf16.mxu0 %v4671_v23 }
 0xec7   :  { %3684 = vmatpush3.bf16.msra.mxu0 %v3961_v14 }
 0xec8   :  { %3685 = vmatprep.subr.bf16.mxu0 %v4671_v23 }
 0xecb   :  { %3686 = vmatpush3.bf16.msra.mxu0 %v3962_v20 }
 0xecc   :  { %3711 = vmatprep.subr.bf16.mxu0 %v4671_v23 }
 0xf81   :  { %v2653_v31 = vpop.f32.mrb[48].mxu0 }
 0xf82   :  { %v3669_v30 = vpop.f32.mrb[49].mxu0 }
 0xf83   :  { %v2656_v32 = vpop.f32.mrb[50].mxu0 }
 0xf84   :  { %v2660_v35 = vpack.c.bf16 %v2656_v32, %v2653_v31  ;;  %v3670_v2 = vpop.f32.mrb[51].mxu0 }
 0xf86   :  { %3688 = vmatmul.mubr.bf16.vlgmr.msra.gmra.mrb[36].mxu0 %v2660_v35 }
 0xf87   :  { %3727 = vmatprep.mubr.msk.bf16.mxu0 %vm4672_vm0, %v4671_v23  ;;  %3712 = vmatpush3.bf16.msra.mxu0 %v3971_v22 }
 0xf88   :  { %3713 = vmatprep.subr.bf16.mxu0 %v4671_v23 }
 0xf8b   :  { %3714 = vmatpush3.bf16.msra.mxu0 %v3972_v27 }
 0xf8c   :  { %3715 = vmatprep.subr.bf16.mxu0 %v4671_v23 }
 0xf8f   :  { %3716 = vmatpush3.bf16.msra.mxu0 %v3973_v33 }
 0xf90   :  { %3717 = vmatprep.subr.bf16.mxu0 %v4671_v23 }
 0xf93   :  { %3718 = vmatpush3.bf16.msra.mxu0 %v3974_v39 }
 0xf94   :  { %3719 = vmatprep.subr.bf16.mxu0 %v4671_v23 }
 0xf97   :  { %3720 = vmatpush3.bf16.msra.mxu0 %v3975_v40 }
 0xf98   :  { %3721 = vmatprep.subr.bf16.mxu0 %v4671_v23 }
 0xf9b   :  { %3722 = vmatpush3.bf16.msra.mxu0 %v3976_v42 }
 0xf9c   :  { %3723 = vmatprep.subr.bf16.mxu0 %v4671_v23 }
 0xf9f   :  { %3724 = vmatpush3.bf16.msra.mxu0 %v3977_v57 }
 0xfa0   :  { %3725 = vmatprep.subr.bf16.mxu0 %v4671_v23 }
 0xfa3   :  { %3726 = vmatpush3.bf16.msra.mxu0 %v3978_v56 }
0x1059   :  { %v2766_v43 = vpop.f32.mrb[36].mxu0 }
0x105a   :  { %v3736_v44 = vadd.f32 %v3735_v41, %v2766_v43  ;;  %v3689_v45 = vpop.f32.mrb[37].mxu0 }
0x105b   :  { %v2769_v48 = vpop.f32.mrb[38].mxu0 }
0x105c   :  { %v3738_v49 = vadd.f32 %v3735_v41, %v2769_v48  ;;  %v3690_v51 = vpop.f32.mrb[39].mxu0  ;;  %v2775_v53 = vmax.f32 %v3736_v44, 0.0 }
0x105e   :  { %v2776_v8 = vmax.f32 %v3738_v49, 0.0 }
0x1060   :  { %v2777_v55 = vpack.c.bf16 %v2776_v8, %v2775_v53 }
0x1062   :  { %3708 = vmatmul.mubr.bf16.vlgmr.msra.gmra.mrb[60].mxu1 %v2777_v55 }
0x1135   :  { %v2883_v47 = vpop.f32.mrb[60].mxu1 }
0x1136   :  { %v2884_v13 = vadd.f32 %v3231_v62, %v2883_v47  ;;  %v3709_v60 = vpop.f32.mrb[61].mxu1 }
0x1137   :  { %v2886_v11 = vpop.f32.mrb[62].mxu1 }
0x1138   :  { %v2887_v59 = vadd.f32 %v3231_v62, %v2886_v11  ;;  %v3710_v61 = vpop.f32.mrb[63].mxu1  ;;  %v2890_v54 = vmax.f32 %v2884_v13, 0.0 }
0x113a   :  { %v2891_v58 = vmax.f32 %v2887_v59, 0.0 }
0x113c   :  { %v2892_v3 = vpack.c.bf16 %v2891_v58, %v2890_v54 }
0x113e   :  { %3728 = vmatmul.mubr.bf16.vlgmr.msra.gmra.mrb[52].mxu0 %v2892_v3 }
0x1211   :  { %v2998_v46 = vpop.f32.mrb[52].mxu0 }
0x1212   :  { %v2999_v63 = vadd.f32 %v3240_v5, %v2998_v46  ;;  %v3729_v10 = vpop.f32.mrb[53].mxu0 }
0x1213   :  { %v3001_v52 = vpop.f32.mrb[54].mxu0 }
0x1214   :  { %v3005_v23 = vadd.f32 %v2999_v63, %v5222_v9  ;;  %v3002_v50 = vadd.f32 %v3240_v5, %v3001_v52  ;;  %v3730_v34 = vpop.f32.mrb[55].mxu0 }
0x1216   :  { %3007 = vst [vmem:[#allocation43] sm:$0xff] %v3005_v23  ;;  %v3006_v19 = vadd.f32 %v3002_v50, %v5224_v12 }
0x1218   :  { %3008 = vst [vmem:[#allocation43 + $0x8] sm:$0xff] %v3006_v19 }
0x1219   :  { %4564 = shalt.err (!%p4561_p2)
}
0x121a   :  { %s4565_s9 = scalar_lea.hbm %s4848_s5, 256 }
0x121b   :  { %p4566_p3 = scmp.ne.s32.totalorder %s4848_s5, %s4565_s9  ;;  %p4569_p4 = scmp.lt.u32.totalorder %s4565_s9, %s4848_s5 }
0x121d   :  { %p4571_p5 = pnand %p4569_p4, %p4566_p3 }
0x121f   :  { %4574 = shalt.err (!%p4571_p5)
}
0x1220   :  { %3020 = dma.vmem_to_hbm [thread:$0]  %s3015_s12, 256, %s4848_s5, [#allocation4], %s4655_s21, %s4655_s21, %s4656_s6  }
0x1221   :  { %4603 = dma.done.wait [#allocation4], 256  }
0x1222   :  { %4604 = vsyncadd [#allocation4], 4294967040 }
0x1223   :  { %3024 = vsyncpa [#allocation3], 1 }
0x1224   :  { %3025 = vsyncpa [#allocation6], 1 }
0x1225   :  { %3026 = vsyncpa [#allocation9], 1 }
0x1226   :  { %3027 = vsyncpa [#allocation12], 1 }
0x1227   :  { %3028 = vsyncpa [#allocation15], 1 }
0x1228   :  { %3029 = vsyncpa [#allocation18], 1 }
0x1229   :  { %3030 = vsyncpa [#allocation21], 1 }
0x122a   :  { %3031 = vsyncpa [#allocation24], 1 }
0x122b   :  { %3032 = vsyncpa [#allocation27], 1 }
0x122c   :  { %3033 = vsyncpa [#allocation30], 1 }
0x122d   :  { %3034 = vsyncpa [#allocation33], 1 }
0x122e   :  { %3035 = vsyncpa [#allocation36], 1 }
0x122f   :  { %3036 = vsyncpa [#allocation39], 1 }
0x1230   :  { %3037 = vsyncpa [#allocation42], 1 }
0x1231   :  { %3038 = vsyncpa [#allocation4], 1 }

</bundles_post_ra>
